<compile_context>
chip_gen: v7x
topology: tpu7x:2x2x1
jax: 0.10.0
libtpu: 0.0.40
codegen_flags: <defaults>
</compile_context>

<pallas_src>
import jax
import jax.numpy as jnp
from jax.experimental import pallas as pl
from jax.experimental.pallas import tpu as pltpu

# ---------------- model hyper-parameters (small, consistent with module) ----
N = 16            # number of 'cell' nodes
IN_C = 8          # in_channels
HID = 32          # hidden_channels
LAT = 16          # latent_channels
HEADS = 8         # GATv2 heads (fixed by module: heads=8)
HD = HID // HEADS # per-head channels = hidden_channels // 8
MODALITIES = ("rna", "atac")
M = len(MODALITIES)
NUM_LAYERS = 2    # -> exactly one GATv2 hetero layer (num_layers - 1)
BN_EPS = 1e-5
NEG_SLOPE = 0.2   # GATv2 default negative_slope
MH = M * HEADS    # 16 fused (modality, head) groups
MC = M * HID      # 64 fused per-modality channels


def _silu(x):
    return x * jax.nn.sigmoid(x)


def _batchnorm_train(x, gamma, beta):
    # nn.BatchNorm1d in training mode: biased batch stats over the node axis.
    mean = jnp.mean(x, axis=0, keepdims=True)
    var = jnp.mean((x - mean) ** 2, axis=0, keepdims=True)
    return (x - mean) * jax.lax.rsqrt(var + BN_EPS) * gamma + beta


# --------------------------------- kernel -----------------------------------
def hetero_gae_kernel(
    x_ref,        # [N, IN_C]
    a_cat_ref,    # [N, M*N]       lane-concat GCN-normalized adjacencies
    a_bias_ref,   # [N*N, MH]      additive attention mask (0 edge / -1e9 not)
    w1_ref,       # [IN_C, M*HID]  conv1 weights, lane-concat over modalities
    b1_ref,       # [1, HID]       sum_m conv1 bias
    wlr_ref,      # [HID, 2*MC]    [wl_0|..|wl_{M-1}|wr_0|..|wr_{M-1}]
    blr_ref,      # [1, 2*MC]
    att_bd_ref,   # [MC, MH]       block-diagonal GATv2 attention vectors
    rep_ref,      # [MH, MC]       (modality,head) -> channel replication
    gb_ref,       # [1, HID]       sum_m GATv2 bias
    wz_ref,       # [HID, M*LAT]
    bz_ref,       # [1, LAT]
    bn1_w_ref, bn1_b_ref,    # [1, HID]
    bn2_w_ref, bn2_b_ref,    # [1, HID]
    z_ref,        # out: [N, LAT]
):
    f32 = jnp.float32
    x = x_ref[...]
    a_cat = a_cat_ref[...]

    # ---- conv1: HeteroConv{GCNConv(in, hidden)}, aggr='sum' (fused) ----
    xw = jnp.dot(x, w1_ref[...], preferred_element_type=f32)             # [N, M*HID]
    xw_stack = jnp.concatenate(
        [xw[:, m * HID:(m + 1) * HID] for m in range(M)], axis=0)        # [M*N, HID]
    h = jnp.dot(a_cat, xw_stack, preferred_element_type=f32) + b1_ref[...]

    # ---- bn1 + SiLU ----
    h = _silu(_batchnorm_train(h, bn1_w_ref[...], bn1_b_ref[...]))

    # ---- one HeteroConv{GATv2Conv(hidden, hidden//8, heads=8)}, aggr='sum' ----
    # Fused linear layers for both modalities: one lane-dense [N,HID]@[HID,128].
    lr = jnp.dot(h, wlr_ref[...], preferred_element_type=f32) + blr_ref[...]
    xl = lr[:, :MC]            # lin_l (source features), [N, M*HID]
    xr = lr[:, MC:]            # lin_r (target features), [N, M*HID]

    # e[i, j, c] = xr[i, c] + xl[j, c]   (i = target, j = source)
    e = xr[:, None, :] + xl[None, :, :]                                  # [N, N, MC]
    e = jnp.where(e > 0, e, NEG_SLOPE * e)                               # leaky_relu
    # logits for all (modality, head) groups in one matmul.
    logits = jnp.dot(e.reshape(N * N, MC), att_bd_ref[...],
                     preferred_element_type=f32) + a_bias_ref[...]       # [N*N, MH]
    logits = logits.reshape(N, N, MH)

    # masked softmax over sources j (self-loops guarantee a finite max per row)
    lmax = jnp.max(logits, axis=1, keepdims=True)                        # [N, 1, MH]
    p = jnp.exp(logits - lmax)
    denom = jnp.sum(p, axis=1, keepdims=True)
    alpha = p * pl.reciprocal(denom, approx=True)                        # [N, N, MH]

    # aggregation: out[i, c] = sum_j alpha[i, j, c//HD] * xl[j, c]
    arep = jnp.dot(alpha.reshape(N * N, MH), rep_ref[...],
                   preferred_element_type=f32).reshape(N, N, MC)         # [N, N, MC]
    agg = jnp.sum(arep * xl[None, :, :], axis=1)                         # [N, MC]
    g = gb_ref[...]
    for m in range(M):                                                   # M=2 lane slices
        g = g + agg[:, m * HID:(m + 1) * HID]

    # ---- bn_layers[0] + SiLU ----
    g = _silu(_batchnorm_train(g, bn2_w_ref[...], bn2_b_ref[...]))

    # ---- z_conv: HeteroConv{GCNConv(hidden, latent)}, aggr='sum' (fused) ----
    gw = jnp.dot(g, wz_ref[...], preferred_element_type=f32)             # [N, M*LAT]
    gw_stack = jnp.concatenate(
        [gw[:, m * LAT:(m + 1) * LAT] for m in range(M)], axis=0)        # [M*N, LAT]
    z_ref[...] = jnp.dot(a_cat, gw_stack, preferred_element_type=f32) + bz_ref[...]


# ------------------------------ wrapper --------------------------------------
def hetero_graph_ae_forward(x, a_gcn, a_mask, params):
    """Layout/parameter fusion (pure rearrangement) + single fused Pallas call."""
    f32 = jnp.float32

    # graph structure in fused layouts
    a_cat = jnp.concatenate([a_gcn[m] for m in range(M)], axis=1)            # [N, M*N]
    a_bias = jnp.repeat((a_mask.reshape(M, N * N).T - 1.0) * 1e9,
                        HEADS, axis=1).astype(f32)                           # [N*N, MH]

    # conv1
    w1_cat = jnp.concatenate([params["w1"][m] for m in range(M)], axis=1)    # [IN_C, M*HID]
    b1_sum = jnp.sum(params["b1"], axis=0, keepdims=True)                    # [1, HID]

    # GATv2 linears (lane-dense 128-wide), attention block-diagonal, bias sum
    wlr_cat = jnp.concatenate([params["wl"][m] for m in range(M)]
                              + [params["wr"][m] for m in range(M)], axis=1)  # [HID, 2*MC]
    blr_cat = jnp.concatenate([params["bl"][m] for m in range(M)]
                              + [params["br"][m] for m in range(M)])[None, :]  # [1, 2*MC]
    att_flat = params["att"].reshape(MH, HD)                                  # row g=(m,h)
    att_bd = (att_flat[:, :, None]
              * jnp.eye(MH, dtype=f32)[:, None, :]).reshape(MC, MH)           # [MC, MH]
    rep = jnp.repeat(jnp.eye(MH, dtype=f32), HD, axis=1)                      # [MH, MC]
    gb_sum = jnp.sum(params["gat_b"], axis=0, keepdims=True)                  # [1, HID]

    # z_conv
    wz_cat = jnp.concatenate([params["wz"][m] for m in range(M)], axis=1)     # [HID, M*LAT]
    bz_sum = jnp.sum(params["bz"], axis=0, keepdims=True)                     # [1, LAT]

    ins = (
        x, a_cat, a_bias,
        w1_cat, b1_sum,
        wlr_cat, blr_cat, att_bd, rep, gb_sum,
        wz_cat, bz_sum,
        params["bn1_w"][None, :], params["bn1_b"][None, :],
        params["bn2_w"][None, :], params["bn2_b"][None, :],
    )
    vmem = pl.BlockSpec(memory_space=pltpu.MemorySpace.VMEM)  # full-array blocks, no grid
    # TODO(synk): for a batch of graphs, add a leading grid axis with
    # dimension_semantics=("parallel",) so v7x's two TensorCores split the batch.
    return pl.pallas_call(
        hetero_gae_kernel,
        out_shape=jax.ShapeDtypeStruct((N, LAT), jnp.float32),
        in_specs=[vmem] * len(ins),
        out_specs=vmem,
    )(*ins)


# -------------------------- deterministic setup -------------------------------
def build_graph(key):
    """Random edge sets per modality -> dense GCN-normalized adj + binary mask."""
    a_gcn, a_mask = [], []
    for _ in range(M):
        key, ks, kd = jax.random.split(key, 3)
        E = 40
        src = jax.random.randint(ks, (E,), 0, N)
        dst = jax.random.randint(kd, (E,), 0, N)
        dst = jnp.where(src == dst, (dst + 1) % N, dst)   # no raw self loops
        # A[i, j] = 1 iff edge j -> i (deduplicated)
        A = jnp.zeros((N, N), jnp.float32).at[dst, src].max(1.0)
        A_hat = jnp.maximum(A, jnp.eye(N, dtype=jnp.float32))  # add_self_loops
        deg = jnp.sum(A_hat, axis=1)                             # in-degree at target
        dinv = jax.lax.rsqrt(deg)
        a_gcn.append(dinv[:, None] * A_hat * dinv[None, :])
        a_mask.append(A_hat)
    return jnp.stack(a_gcn), jnp.stack(a_mask), key


def init_params(key):
    def glorot(k, shape):
        fan_in, fan_out = shape[-2], shape[-1]
        s = (6.0 / (fan_in + fan_out)) ** 0.5
        return jax.random.uniform(k, shape, jnp.float32, -s, s)

    k = jax.random.split(key, 5)
    p = {
        "w1": glorot(k[0], (M, IN_C, HID)),
        "b1": jnp.zeros((M, HID), jnp.float32),
        "wl": glorot(k[1], (M, HID, HID)),
        "bl": jnp.zeros((M, HID), jnp.float32),
        "wr": glorot(k[2], (M, HID, HID)),
        "br": jnp.zeros((M, HID), jnp.float32),
        "att": glorot(k[3], (M, HEADS, HD)),
        "gat_b": jnp.zeros((M, HID), jnp.float32),
        "wz": glorot(k[4], (M, HID, LAT)),
        "bz": jnp.zeros((M, LAT), jnp.float32),
        "bn1_w": jnp.ones((HID,), jnp.float32),
        "bn1_b": jnp.zeros((HID,), jnp.float32),
        "bn2_w": jnp.ones((HID,), jnp.float32),
        "bn2_b": jnp.zeros((HID,), jnp.float32),
    }
    return p


if __name__ == "__main__":
    key = jax.random.PRNGKey(0)
    key, kx, kp = jax.random.split(key, 3)
    x = jax.random.normal(kx, (N, IN_C), jnp.float32)      # data['cell'].x
    a_gcn, a_mask, key = build_graph(key)                  # data.edge_index_dict (dense)
    params = init_params(kp)

    z = hetero_graph_ae_forward(x, a_gcn, a_mask, params)  # forward(data) -> z
    jax.block_until_ready(z)
    assert z.shape == (N, LAT) and z.dtype == jnp.float32
    assert bool(jnp.all(jnp.isfinite(z)))
    # TODO(synk): decode() (per-modality Linear+Sigmoid on edge dot-products) is not
    # part of forward(); it is intentionally not implemented here.
    print("KERNEL_OK")
</pallas_src>

<mosaic_0001>
module attributes {stable_mosaic.version = 11 : i64} {
  func.func @hetero_gae_kernel(%arg0: memref<16x8xf32, #tpu.memory_space<vmem>>, %arg1: memref<16x32xf32, #tpu.memory_space<vmem>>, %arg2: memref<256x16xf32, #tpu.memory_space<vmem>>, %arg3: memref<8x64xf32, #tpu.memory_space<vmem>>, %arg4: memref<1x32xf32, #tpu.memory_space<vmem>>, %arg5: memref<32x128xf32, #tpu.memory_space<vmem>>, %arg6: memref<1x128xf32, #tpu.memory_space<vmem>>, %arg7: memref<64x16xf32, #tpu.memory_space<vmem>>, %arg8: memref<16x64xf32, #tpu.memory_space<vmem>>, %arg9: memref<1x32xf32, #tpu.memory_space<vmem>>, %arg10: memref<32x32xf32, #tpu.memory_space<vmem>>, %arg11: memref<1x16xf32, #tpu.memory_space<vmem>>, %arg12: memref<1x32xf32, #tpu.memory_space<vmem>>, %arg13: memref<1x32xf32, #tpu.memory_space<vmem>>, %arg14: memref<1x32xf32, #tpu.memory_space<vmem>>, %arg15: memref<1x32xf32, #tpu.memory_space<vmem>>, %arg16: memref<16x16xf32, #tpu.memory_space<vmem>>) attributes {dimension_semantics = [], scalar_prefetch = 0 : i64, scratch_operands = 0 : i64, tpu.core_type = #tpu.core_type<tc>} {
    %c0 = arith.constant 0 : index
    %c0_0 = arith.constant 0 : index
    %0 = vector.load %arg0[%c0, %c0_0] : memref<16x8xf32, #tpu.memory_space<vmem>>, vector<16x8xf32>
    %c0_1 = arith.constant 0 : index
    %c0_2 = arith.constant 0 : index
    %1 = vector.load %arg1[%c0_1, %c0_2] : memref<16x32xf32, #tpu.memory_space<vmem>>, vector<16x32xf32>
    %c0_3 = arith.constant 0 : index
    %c0_4 = arith.constant 0 : index
    %2 = vector.load %arg3[%c0_3, %c0_4] : memref<8x64xf32, #tpu.memory_space<vmem>>, vector<8x64xf32>
    %cst = arith.constant dense<0.000000e+00> : vector<16x64xf32>
    %3 = tpu.matmul %0, %2, %cst {dimension_numbers = #tpu.dot_dimension_numbers<[1], [0], [0], [1], [0, 0, 1, 1], [], []>} : vector<16x8xf32>, vector<8x64xf32>, vector<16x64xf32> -> vector<16x64xf32>
    %4 = vector.extract_strided_slice %3 {offsets = [0, 0], sizes = [16, 32], strides = [1, 1]} : vector<16x64xf32> to vector<16x32xf32>
    %5 = vector.extract_strided_slice %3 {offsets = [0, 32], sizes = [16, 32], strides = [1, 1]} : vector<16x64xf32> to vector<16x32xf32>
    %6 = tpu.concatenate %4, %5 in 0 : vector<16x32xf32>, vector<16x32xf32> -> vector<32x32xf32>
    %cst_5 = arith.constant dense<0.000000e+00> : vector<16x32xf32>
    %7 = tpu.matmul %1, %6, %cst_5 {dimension_numbers = #tpu.dot_dimension_numbers<[1], [0], [0], [1], [0, 0, 1, 1], [], []>} : vector<16x32xf32>, vector<32x32xf32>, vector<16x32xf32> -> vector<16x32xf32>
    %c0_6 = arith.constant 0 : index
    %c0_7 = arith.constant 0 : index
    %8 = vector.load %arg4[%c0_6, %c0_7] : memref<1x32xf32, #tpu.memory_space<vmem>>, vector<1x32xf32>
    %9 = vector.broadcast %8 : vector<1x32xf32> to vector<16x32xf32>
    %10 = arith.addf %7, %9 : vector<16x32xf32>
    %c0_8 = arith.constant 0 : index
    %c0_9 = arith.constant 0 : index
    %11 = vector.load %arg12[%c0_8, %c0_9] : memref<1x32xf32, #tpu.memory_space<vmem>>, vector<1x32xf32>
    %c0_10 = arith.constant 0 : index
    %c0_11 = arith.constant 0 : index
    %12 = vector.load %arg13[%c0_10, %c0_11] : memref<1x32xf32, #tpu.memory_space<vmem>>, vector<1x32xf32>
    %cst_12 = arith.constant dense<0.000000e+00> : vector<32xf32>
    %13 = vector.multi_reduction <add>, %10, %cst_12 [0] : vector<16x32xf32> to vector<32xf32>
    %14 = vector.shape_cast %13 : vector<32xf32> to vector<1x32xf32>
    %cst_13 = arith.constant 1.600000e+01 : f32
    %15 = vector.broadcast %cst_13 : f32 to vector<1x32xf32>
    %16 = arith.divf %14, %15 : vector<1x32xf32>
    %17 = vector.broadcast %16 : vector<1x32xf32> to vector<16x32xf32>
    %18 = arith.subf %10, %17 : vector<16x32xf32>
    %19 = arith.mulf %18, %18 : vector<16x32xf32>
    %cst_14 = arith.constant dense<0.000000e+00> : vector<32xf32>
    %20 = vector.multi_reduction <add>, %19, %cst_14 [0] : vector<16x32xf32> to vector<32xf32>
    %21 = vector.shape_cast %20 : vector<32xf32> to vector<1x32xf32>
    %cst_15 = arith.constant 1.600000e+01 : f32
    %22 = vector.broadcast %cst_15 : f32 to vector<1x32xf32>
    %23 = arith.divf %21, %22 : vector<1x32xf32>
    %24 = vector.broadcast %16 : vector<1x32xf32> to vector<16x32xf32>
    %25 = arith.subf %10, %24 : vector<16x32xf32>
    %cst_16 = arith.constant 9.99999974E-6 : f32
    %26 = vector.broadcast %cst_16 : f32 to vector<1x32xf32>
    %27 = arith.addf %23, %26 : vector<1x32xf32>
    %28 = math.rsqrt %27 : vector<1x32xf32>
    %29 = vector.broadcast %28 : vector<1x32xf32> to vector<16x32xf32>
    %30 = arith.mulf %25, %29 : vector<16x32xf32>
    %31 = vector.broadcast %11 : vector<1x32xf32> to vector<16x32xf32>
    %32 = arith.mulf %30, %31 : vector<16x32xf32>
    %33 = vector.broadcast %12 : vector<1x32xf32> to vector<16x32xf32>
    %34 = arith.addf %32, %33 : vector<16x32xf32>
    %35 = arith.negf %34 : vector<16x32xf32>
    %36 = math.exp %35 : vector<16x32xf32>
    %cst_17 = arith.constant 1.000000e+00 : f32
    %37 = vector.broadcast %cst_17 : f32 to vector<16x32xf32>
    %38 = arith.addf %37, %36 : vector<16x32xf32>
    %39 = arith.divf %37, %38 : vector<16x32xf32>
    %40 = arith.mulf %34, %39 : vector<16x32xf32>
    %c0_18 = arith.constant 0 : index
    %c0_19 = arith.constant 0 : index
    %41 = vector.load %arg5[%c0_18, %c0_19] : memref<32x128xf32, #tpu.memory_space<vmem>>, vector<32x128xf32>
    %cst_20 = arith.constant dense<0.000000e+00> : vector<16x128xf32>
    %42 = tpu.matmul %40, %41, %cst_20 {dimension_numbers = #tpu.dot_dimension_numbers<[1], [0], [0], [1], [0, 0, 1, 1], [], []>} : vector<16x32xf32>, vector<32x128xf32>, vector<16x128xf32> -> vector<16x128xf32>
    %c0_21 = arith.constant 0 : index
    %c0_22 = arith.constant 0 : index
    %43 = vector.load %arg6[%c0_21, %c0_22] : memref<1x128xf32, #tpu.memory_space<vmem>>, vector<1x128xf32>
    %44 = vector.broadcast %43 : vector<1x128xf32> to vector<16x128xf32>
    %45 = arith.addf %42, %44 : vector<16x128xf32>
    %46 = vector.extract_strided_slice %45 {offsets = [0, 0], sizes = [16, 64], strides = [1, 1]} : vector<16x128xf32> to vector<16x64xf32>
    %47 = vector.extract_strided_slice %45 {offsets = [0, 64], sizes = [16, 64], strides = [1, 1]} : vector<16x128xf32> to vector<16x64xf32>
    %48 = vector.shape_cast %47 : vector<16x64xf32> to vector<16x1x64xf32>
    %49 = vector.shape_cast %46 : vector<16x64xf32> to vector<1x16x64xf32>
    %50 = vector.broadcast %48 : vector<16x1x64xf32> to vector<16x16x64xf32>
    %51 = vector.broadcast %49 : vector<1x16x64xf32> to vector<16x16x64xf32>
    %52 = arith.addf %50, %51 : vector<16x16x64xf32>
    %cst_23 = arith.constant 0.000000e+00 : f32
    %53 = vector.broadcast %cst_23 : f32 to vector<16x16x64xf32>
    %54 = arith.cmpf ogt, %52, %53 : vector<16x16x64xf32>
    %cst_24 = arith.constant 2.000000e-01 : f32
    %55 = vector.broadcast %cst_24 : f32 to vector<16x16x64xf32>
    %56 = arith.mulf %55, %52 : vector<16x16x64xf32>
    %57 = arith.select %54, %52, %56 : vector<16x16x64xi1>, vector<16x16x64xf32>
    %58 = vector.shape_cast %57 : vector<16x16x64xf32> to vector<256x64xf32>
    %c0_25 = arith.constant 0 : index
    %c0_26 = arith.constant 0 : index
    %59 = vector.load %arg7[%c0_25, %c0_26] : memref<64x16xf32, #tpu.memory_space<vmem>>, vector<64x16xf32>
    %cst_27 = arith.constant dense<0.000000e+00> : vector<256x16xf32>
    %60 = tpu.matmul %58, %59, %cst_27 {dimension_numbers = #tpu.dot_dimension_numbers<[1], [0], [0], [1], [0, 0, 1, 1], [], []>} : vector<256x64xf32>, vector<64x16xf32>, vector<256x16xf32> -> vector<256x16xf32>
    %c0_28 = arith.constant 0 : index
    %c0_29 = arith.constant 0 : index
    %61 = vector.load %arg2[%c0_28, %c0_29] : memref<256x16xf32, #tpu.memory_space<vmem>>, vector<256x16xf32>
    %62 = arith.addf %60, %61 : vector<256x16xf32>
    %63 = vector.shape_cast %62 : vector<256x16xf32> to vector<16x16x16xf32>
    %cst_30 = arith.constant dense<0xFF800000> : vector<16x16xf32>
    %64 = vector.multi_reduction <maximumf>, %63, %cst_30 [1] : vector<16x16x16xf32> to vector<16x16xf32>
    %65 = vector.shape_cast %64 : vector<16x16xf32> to vector<16x1x16xf32>
    %66 = vector.broadcast %65 : vector<16x1x16xf32> to vector<16x16x16xf32>
    %67 = arith.subf %63, %66 : vector<16x16x16xf32>
    %68 = math.exp %67 : vector<16x16x16xf32>
    %cst_31 = arith.constant dense<0.000000e+00> : vector<16x16xf32>
    %69 = vector.multi_reduction <add>, %68, %cst_31 [1] : vector<16x16x16xf32> to vector<16x16xf32>
    %70 = vector.shape_cast %69 : vector<16x16xf32> to vector<16x1x16xf32>
    %71 = tpu.reciprocal %70 {approx = true} : vector<16x1x16xf32> -> vector<16x1x16xf32>
    %72 = vector.broadcast %71 : vector<16x1x16xf32> to vector<16x16x16xf32>
    %73 = arith.mulf %68, %72 : vector<16x16x16xf32>
    %74 = vector.shape_cast %73 : vector<16x16x16xf32> to vector<256x16xf32>
    %c0_32 = arith.constant 0 : index
    %c0_33 = arith.constant 0 : index
    %75 = vector.load %arg8[%c0_32, %c0_33] : memref<16x64xf32, #tpu.memory_space<vmem>>, vector<16x64xf32>
    %cst_34 = arith.constant dense<0.000000e+00> : vector<256x64xf32>
    %76 = tpu.matmul %74, %75, %cst_34 {dimension_numbers = #tpu.dot_dimension_numbers<[1], [0], [0], [1], [0, 0, 1, 1], [], []>} : vector<256x16xf32>, vector<16x64xf32>, vector<256x64xf32> -> vector<256x64xf32>
    %77 = vector.shape_cast %76 : vector<256x64xf32> to vector<16x16x64xf32>
    %78 = vector.shape_cast %46 : vector<16x64xf32> to vector<1x16x64xf32>
    %79 = vector.broadcast %78 : vector<1x16x64xf32> to vector<16x16x64xf32>
    %80 = arith.mulf %77, %79 : vector<16x16x64xf32>
    %cst_35 = arith.constant dense<0.000000e+00> : vector<16x64xf32>
    %81 = vector.multi_reduction <add>, %80, %cst_35 [1] : vector<16x16x64xf32> to vector<16x64xf32>
    %c0_36 = arith.constant 0 : index
    %c0_37 = arith.constant 0 : index
    %82 = vector.load %arg9[%c0_36, %c0_37] : memref<1x32xf32, #tpu.memory_space<vmem>>, vector<1x32xf32>
    %83 = vector.extract_strided_slice %81 {offsets = [0, 0], sizes = [16, 32], strides = [1, 1]} : vector<16x64xf32> to vector<16x32xf32>
    %84 = vector.broadcast %82 : vector<1x32xf32> to vector<16x32xf32>
    %85 = arith.addf %84, %83 : vector<16x32xf32>
    %86 = vector.extract_strided_slice %81 {offsets = [0, 32], sizes = [16, 32], strides = [1, 1]} : vector<16x64xf32> to vector<16x32xf32>
    %87 = arith.addf %85, %86 : vector<16x32xf32>
    %c0_38 = arith.constant 0 : index
    %c0_39 = arith.constant 0 : index
    %88 = vector.load %arg14[%c0_38, %c0_39] : memref<1x32xf32, #tpu.memory_space<vmem>>, vector<1x32xf32>
    %c0_40 = arith.constant 0 : index
    %c0_41 = arith.constant 0 : index
    %89 = vector.load %arg15[%c0_40, %c0_41] : memref<1x32xf32, #tpu.memory_space<vmem>>, vector<1x32xf32>
    %cst_42 = arith.constant dense<0.000000e+00> : vector<32xf32>
    %90 = vector.multi_reduction <add>, %87, %cst_42 [0] : vector<16x32xf32> to vector<32xf32>
    %91 = vector.shape_cast %90 : vector<32xf32> to vector<1x32xf32>
    %cst_43 = arith.constant 1.600000e+01 : f32
    %92 = vector.broadcast %cst_43 : f32 to vector<1x32xf32>
    %93 = arith.divf %91, %92 : vector<1x32xf32>
    %94 = vector.broadcast %93 : vector<1x32xf32> to vector<16x32xf32>
    %95 = arith.subf %87, %94 : vector<16x32xf32>
    %96 = arith.mulf %95, %95 : vector<16x32xf32>
    %cst_44 = arith.constant dense<0.000000e+00> : vector<32xf32>
    %97 = vector.multi_reduction <add>, %96, %cst_44 [0] : vector<16x32xf32> to vector<32xf32>
    %98 = vector.shape_cast %97 : vector<32xf32> to vector<1x32xf32>
    %cst_45 = arith.constant 1.600000e+01 : f32
    %99 = vector.broadcast %cst_45 : f32 to vector<1x32xf32>
    %100 = arith.divf %98, %99 : vector<1x32xf32>
    %101 = vector.broadcast %93 : vector<1x32xf32> to vector<16x32xf32>
    %102 = arith.subf %87, %101 : vector<16x32xf32>
    %cst_46 = arith.constant 9.99999974E-6 : f32
    %103 = vector.broadcast %cst_46 : f32 to vector<1x32xf32>
    %104 = arith.addf %100, %103 : vector<1x32xf32>
    %105 = math.rsqrt %104 : vector<1x32xf32>
    %106 = vector.broadcast %105 : vector<1x32xf32> to vector<16x32xf32>
    %107 = arith.mulf %102, %106 : vector<16x32xf32>
    %108 = vector.broadcast %88 : vector<1x32xf32> to vector<16x32xf32>
    %109 = arith.mulf %107, %108 : vector<16x32xf32>
    %110 = vector.broadcast %89 : vector<1x32xf32> to vector<16x32xf32>
    %111 = arith.addf %109, %110 : vector<16x32xf32>
    %112 = arith.negf %111 : vector<16x32xf32>
    %113 = math.exp %112 : vector<16x32xf32>
    %cst_47 = arith.constant 1.000000e+00 : f32
    %114 = vector.broadcast %cst_47 : f32 to vector<16x32xf32>
    %115 = arith.addf %114, %113 : vector<16x32xf32>
    %116 = arith.divf %114, %115 : vector<16x32xf32>
    %117 = arith.mulf %111, %116 : vector<16x32xf32>
    %c0_48 = arith.constant 0 : index
    %c0_49 = arith.constant 0 : index
    %118 = vector.load %arg10[%c0_48, %c0_49] : memref<32x32xf32, #tpu.memory_space<vmem>>, vector<32x32xf32>
    %cst_50 = arith.constant dense<0.000000e+00> : vector<16x32xf32>
    %119 = tpu.matmul %117, %118, %cst_50 {dimension_numbers = #tpu.dot_dimension_numbers<[1], [0], [0], [1], [0, 0, 1, 1], [], []>} : vector<16x32xf32>, vector<32x32xf32>, vector<16x32xf32> -> vector<16x32xf32>
    %120 = vector.extract_strided_slice %119 {offsets = [0, 0], sizes = [16, 16], strides = [1, 1]} : vector<16x32xf32> to vector<16x16xf32>
    %121 = vector.extract_strided_slice %119 {offsets = [0, 16], sizes = [16, 16], strides = [1, 1]} : vector<16x32xf32> to vector<16x16xf32>
    %122 = tpu.concatenate %120, %121 in 0 : vector<16x16xf32>, vector<16x16xf32> -> vector<32x16xf32>
    %cst_51 = arith.constant dense<0.000000e+00> : vector<16x16xf32>
    %123 = tpu.matmul %1, %122, %cst_51 {dimension_numbers = #tpu.dot_dimension_numbers<[1], [0], [0], [1], [0, 0, 1, 1], [], []>} : vector<16x32xf32>, vector<32x16xf32>, vector<16x16xf32> -> vector<16x16xf32>
    %c0_52 = arith.constant 0 : index
    %c0_53 = arith.constant 0 : index
    %124 = vector.load %arg11[%c0_52, %c0_53] : memref<1x16xf32, #tpu.memory_space<vmem>>, vector<1x16xf32>
    %125 = vector.broadcast %124 : vector<1x16xf32> to vector<16x16xf32>
    %126 = arith.addf %123, %125 : vector<16x16xf32>
    %c0_54 = arith.constant 0 : index
    %c0_55 = arith.constant 0 : index
    %127 = vector.load %arg16[%c0_54, %c0_55] : memref<16x16xf32, #tpu.memory_space<vmem>>, vector<16x16xf32>
    tpu.vector_store %arg16[%c0_54, %c0_55], %126 {strides = array<i32>} : memref<16x16xf32, #tpu.memory_space<vmem>>, vector<16x16xf32>,
    return
  }
}

</mosaic_0001>

<bundles_post_ra>
// kernel: tpu_custom_call.1
= control target key start
LH: loop header
LB: loop body
LE: loop exit
PB: predicated region body
PF: predicated region fallthrough
CT: control target
= control target key end

     0   :  { %s3906_s0 = inlined_call_operand.vmem [shape: f32[16,8], index: 0, kind: input, shape index: {}]   ;;  %s3907_s1 = inlined_call_operand.vmem [shape: f32[16,32], index: 1, kind: input, shape index: {}]   ;;  %s3908_s2 = inlined_call_operand.vmem [shape: f32[256,16], index: 2, kind: input, shape index: {}]   ;;  %s3909_s3 = inlined_call_operand.vmem [shape: f32[8,64], index: 3, kind: input, shape index: {}]   ;;  %s3910_s4 = inlined_call_operand.vmem [shape: f32[1,32], index: 4, kind: input, shape index: {}]   ;;  %s3911_s5 = inlined_call_operand.vmem [shape: f32[32,128], index: 5, kind: input, shape index: {}]   ;;  %s3912_s6 = inlined_call_operand.vmem [shape: f32[1,128], index: 6, kind: input, shape index: {}]   ;;  %s3913_s7 = inlined_call_operand.vmem [shape: f32[64,16], index: 7, kind: input, shape index: {}]   ;;  %s3914_s8 = inlined_call_operand.vmem [shape: f32[16,64], index: 8, kind: input, shape index: {}]   ;;  %s3915_s9 = inlined_call_operand.vmem [shape: f32[1,32], index: 9, kind: input, shape index: {}]   ;;  %s3916_s10 = inlined_call_operand.vmem [shape: f32[32,32], index: 10, kind: input, shape index: {}]   ;;  %s3917_s11 = inlined_call_operand.vmem [shape: f32[1,16], index: 11, kind: input, shape index: {}]   ;;  %s3918_s12 = inlined_call_operand.vmem [shape: f32[1,32], index: 12, kind: input, shape index: {}]   ;;  %s3919_s13 = inlined_call_operand.vmem [shape: f32[1,32], index: 13, kind: input, shape index: {}]   ;;  %s3920_s14 = inlined_call_operand.vmem [shape: f32[1,32], index: 14, kind: input, shape index: {}]   ;;  %s3921_s15 = inlined_call_operand.vmem [shape: f32[1,32], index: 15, kind: input, shape index: {}]   ;;  %s3922_s16 = inlined_call_operand.hbm [shape: f32[16,16], index: 16, kind: output, shape index: {}]  }
   0x1   :  { %3926 = sst [smem:[#allocation6_spill]] %s3906_s0 }
   0x2   :  { %v58_v0 = vld [vmem:[%s3909_s3] sm:$0xff]  ;;  %s3927_s25 = sld [smem:[#allocation6_spill]]  ;;  %vm59_vm0 = vcmask 64512  }
   0x3   :  { %2559 = vmatprep.subr.mxu0 %v58_v0 }
   0x8   :  { %v54_v1 = vld [vmem:[%s3927_s25] sm:$0xff]  ;;  %v55_v2 = vld [vmem:[%s3927_s25 + $0x8] sm:$0xff] }
   0x9   :  { %2561 = vmatprep.mubr.msk.f32.mxu0 %vm59_vm0, %v54_v1 }
   0xa   :  { %21 = vsyncpa [#allocation3], 0  ;;  %2560 = vmatpush3.msra.mxu0 %v58_v0  ;;  %v56_v3 = vld [vmem:[%s3907_s1] sm:$0xff]  ;;  %vm156_vm1 = vcmask 261120   ;;  %s2935_s3 = smov 96   ;;  %v57_v12 = vld [vmem:[%s3907_s1 + $0x8] sm:$0xff] }
   0xb   :  { %2562 = vmatmul.mubr.msk.f32.vlgmr.msra.gmra.mrb[0].mxu0 %vm59_vm0, %v55_v2  ;;  %2572 = vmatprep.mubr.msk.f32.mxu1 %vm156_vm1, %v56_v3  ;;  %v299_v13 = vld [vmem:[%s3911_s5] sm:$0xff]  ;;  %v300_v14 = vld [vmem:[%s3911_s5 + $0x8] sm:$0xff]  ;;  %v301_v15 = vld [vmem:[%s3911_s5 + $0x10] sm:$0xff]  ;;  %s2936_s29 = smov 64   ;;  %s2938_s20 = smov 112  }
   0xc   :  { %v2732_v16 = vpack.c.bf16 %v300_v14, %v299_v13  ;;  %v302_v17 = vld [vmem:[%s3911_s5 + $0x18] sm:$0xff]  ;;  %v2374_v19 = vld [vmem:[%s3910_s4] ss:$0 sm:$0xff]  ;;  %s2939_s25 = smov [#allocation2]  }
   0xd   :  { %v2736_v18 = vpack.c.bf16 %v302_v17, %v301_v15  ;;  %v2377_v50 = vld [vmem:[%s3918_s12] ss:$0 sm:$0xff]  ;;  %v708_v13 = vld [vmem:[%s3913_s7 + $0x18] sm:$0xff]  ;;  %s2361_s26 = sshll.u32 %s2939_s25, 4  ;;  %s2362_s26 = int_to_ptr.vmem [resolvable:$true] %s2361_s26 }
   0xe   :  { %2733 = vmatprep.subr.bf16.mxu0 %v2732_v16  ;;  %v2378_v53 = vld [vmem:[%s3919_s13] ss:$0 sm:$0xff]  ;;  %s2911_s4 = scalar_lea.vmem %s2362_s26, 256  ;;  %p2916_p1 = scmp.lt.s32.totalorder %s2362_s26, %s2362_s26 }
   0xf   :  { %2735 = vmatpush3.bf16.msra.mxu0 %v2732_v16  ;;  %v709_v15 = vld [vmem:[%s3913_s7 + $0x20] sm:$0xff]  ;;  %v710_v16 = vld [vmem:[%s3913_s7 + $0x28] sm:$0xff]  ;;  %p2912_p0 = scmp.ne.s32.totalorder %s2362_s26, %s2911_s4  ;;  %p2917_p2 = scmp.lt.s32.totalorder %s2911_s4, %s2911_s4 }
  0x10   :  { %2737 = vmatprep.subr.bf16.mxu0 %v2736_v18  ;;  %v2748_v17 = vpack.c.bf16 %v710_v16, %v709_v15 }
  0x11   :  { %p2918_p3 = por %p2917_p2, %p2916_p1 }
  0x13   :  { %2739 = vmatpush3.bf16.msra.mxu0 %v2736_v18  ;;  %v711_v18 = vld [vmem:[%s3913_s7 + $0x30] sm:$0xff]  ;;  %p2919_p4 = pnand %p2918_p3, %p2912_p0 }
  0xde   :  { %v2563_v4 = vpop.f32.mrb[0].mxu0 }
  0xdf   :  { %v132_v5 = vpop.f32.mrb[1].mxu0 }
  0xe0   :  { %v2783_v6 = vpack.i.bf16 %v2563_v4, %v132_v5  ;;  %v2724_v7 = vpack.c.bf16 %v2563_v4, %v132_v5  ;;  %v2381_v4 = vld [vmem:[%s3912_s6] ss:$0 sm:$0xff] }
  0xe2   :  { %2784 = vrot.lane.b32.xlu0 %v2783_v6, %s2935_s3  ;;  %2725 = vmatprep.subr.bf16.mxu1 %v2724_v7 }
  0xe3   :  { %2727 = vmatpush3.bf16.msra.mxu1 %v2724_v7 }
 0x154   :  { %v2785_v8 = vpop.permute.xlu0 %2784 }
 0x155   :  { %v2787_v9 = vunpack.i.h.bf16 %v2785_v8  ;;  %v2786_v10 = vunpack.i.l.bf16 %v2785_v8 }
 0x157   :  { %v2728_v11 = vpack.c.bf16 %v2787_v9, %v2786_v10  ;;  %v705_v9 = vld [vmem:[%s3913_s7] sm:$0xff]  ;;  %v706_v10 = vld [vmem:[%s3913_s7 + $0x8] sm:$0xff] }
 0x159   :  { %2729 = vmatprep.subr.bf16.mxu1 %v2728_v11 }
 0x15a   :  { %2731 = vmatpush3.bf16.msra.mxu1 %v2728_v11  ;;  %v707_v11 = vld [vmem:[%s3913_s7 + $0x10] sm:$0xff] }
 0x15b   :  { %v2744_v14 = vpack.c.bf16 %v708_v13, %v707_v11 }
 0x15d   :  { %2573 = vmatmul.mubr.msk.f32.vlgmr.msra.gmra.mrb[0].mxu1 %vm156_vm1, %v57_v12  ;;  %v2740_v12 = vpack.c.bf16 %v706_v10, %v705_v9 }
 0x15f   :  { %2741 = vmatprep.subr.bf16.mxu1 %v2740_v12 }
 0x160   :  { %2743 = vmatpush3.bf16.msra.mxu1 %v2740_v12 }
 0x161   :  { %2745 = vmatprep.subr.bf16.mxu1 %v2744_v14 }
 0x164   :  { %2747 = vmatpush3.bf16.msra.mxu1 %v2744_v14 }
 0x165   :  { %2749 = vmatprep.subr.bf16.mxu1 %v2748_v17 }
 0x168   :  { %2751 = vmatpush3.bf16.msra.mxu1 %v2748_v17 }
 0x230   :  { %v2574_v20 = vpop.f32.mrb[0].mxu1 }
 0x231   :  { %v235_v21 = vadd.f32 %v2574_v20, %v2374_v19  ;;  %v229_v22 = vpop.f32.mrb[1].mxu1 }
 0x232   :  { %v230_v23 = vadd.f32 %v2374_v19, %v229_v22  ;;  %v712_v19 = vld [vmem:[%s3913_s7 + $0x38] sm:$0xff] }
 0x233   :  { %v241_v24 = vsel %vm156_vm1, %v235_v21, 0.0  ;;  %v2752_v20 = vpack.c.bf16 %v712_v19, %v711_v18 }
 0x234   :  { %v240_v25 = vsel %vm156_vm1, %v230_v23, 0.0 }
 0x235   :  { %v242_v26 = vadd.f32 %v241_v24, %v240_v25  ;;  %2753 = vmatprep.subr.bf16.mxu1 %v2752_v20 }
 0x236   :  { %2755 = vmatpush3.bf16.msra.mxu1 %v2752_v20 }
 0x237   :  { %v243_v27 = vrot.slane %v242_v26, 4 }
 0x239   :  { %v244_v28 = vadd.f32 %v243_v27, %v242_v26 }
 0x23b   :  { %v245_v29 = vrot.slane %v244_v28, 2 }
 0x23d   :  { %v246_v30 = vadd.f32 %v245_v29, %v244_v28 }
 0x23f   :  { %v247_v31 = vrot.slane %v246_v30, 1 }
 0x241   :  { %v248_v32 = vadd.f32 %v247_v31, %v246_v30 }
 0x243   :  { %v250_v33 = vmul.f32 0.0625, %v248_v32 }
 0x245   :  { %v251_v34 = vsub.f32 %v230_v23, %v250_v33  ;;  %v252_v35 = vsub.f32 %v235_v21, %v250_v33  ;;  %v2937_v21 = vmov 1966171168   ;;  %v397_v23 = vlaneseq }
 0x246   :  { %v395_v22 = vunpack.c.l.s4 %v2937_v21 }
 0x247   :  { %v253_v36 = vmul.f32 %v251_v34, %v251_v34  ;;  %v254_v37 = vmul.f32 %v252_v35, %v252_v35  ;;  %v398_v25 = vshrl.u32 %v397_v23, 7 }
 0x248   :  { %v396_v24 = vunpack.c.0.s8 %v395_v22 }
 0x249   :  { %v255_v38 = vsel %vm156_vm1, %v253_v36, 0.0  ;;  %v256_v39 = vsel %vm156_vm1, %v254_v37, 0.0  ;;  %v3112_v30 = vsub.s32 0, %v398_v25 }
 0x24a   :  { %v257_v40 = vadd.f32 %v256_v39, %v255_v38  ;;  %v3107_v26 = vsub.s32 %v396_v24, %v398_v25 }
 0x24c   :  { %v258_v41 = vrot.slane %v257_v40, 4 }
 0x24e   :  { %v259_v42 = vadd.f32 %v258_v41, %v257_v40 }
 0x250   :  { %v260_v43 = vrot.slane %v259_v42, 2 }
 0x252   :  { %v261_v44 = vadd.f32 %v260_v43, %v259_v42 }
 0x254   :  { %v262_v45 = vrot.slane %v261_v44, 1 }
 0x256   :  { %v263_v46 = vadd.f32 %v262_v45, %v261_v44 }
 0x258   :  { %v264_v47 = vmul.f32 0.0625, %v263_v46 }
 0x25a   :  { %v265_v48 = vadd.f32 1e-05, %v264_v47 }
 0x25c   :  { %2793 = vrsqrt.f32 %v265_v48 }
 0x266   :  { %v2794_v49 = vpop.eup %2793 }
 0x267   :  { %v267_v51 = vmul.f32 %v2794_v49, %v251_v34  ;;  %v268_v52 = vmul.f32 %v2794_v49, %v252_v35 }
 0x269   :  { %v275_v54 = vmul.f32 %v2377_v50, %v267_v51  ;;  %v276_v55 = vmul.f32 %v2377_v50, %v268_v52 }
 0x26b   :  { %v283_v56 = vadd.f32 %v2378_v53, %v275_v54  ;;  %v284_v57 = vadd.f32 %v2378_v53, %v276_v55 }
 0x26d   :  { %v2379_v58 = vmul.f32 -1.442695, %v283_v56  ;;  %v2380_v59 = vmul.f32 -1.442695, %v284_v57 }
 0x26f   :  { %2795 = vpow2.f32 %v2379_v58 }
 0x270   :  { %2797 = vpow2.f32 %v2380_v59 }
 0x279   :  { %v2796_v60 = vpop.eup %2795 }
 0x27a   :  { %v2798_v61 = vpop.eup %2797  ;;  %v291_v62 = vadd.f32 1.0, %v2796_v60 }
 0x27b   :  { %v292_v63 = vadd.f32 1.0, %v2798_v61 }
 0x27c   :  { %2799 = vrcp.f32 %v291_v62 }
 0x27d   :  { %2801 = vrcp.f32 %v292_v63 }
 0x286   :  { %v2800_v0 = vpop.eup %2799 }
 0x287   :  { %v2802_v1 = vpop.eup %2801  ;;  %v297_v2 = vmul.f32 %v2800_v0, %v283_v56 }
 0x288   :  { %v298_v3 = vmul.f32 %v2802_v1, %v284_v57 }
 0x289   :  { %2583 = vmatprep.mubr.msk.f32.mxu0 %vm156_vm1, %v297_v2 }
 0x28a   :  { %2584 = vmatmul.mubr.msk.f32.vlgmr.msra.gmra.mrb[2].mxu0 %vm156_vm1, %v298_v3 }
 0x35d   :  { %v2585_v5 = vpop.f32.mrb[2].mxu0 }
 0x35e   :  { %v3075_v6 = vadd.f32 %v2585_v5, %v2381_v4  ;;  %v382_v7 = vpop.f32.mrb[3].mxu0 }
 0x35f   :  { %v3077_v8 = vadd.f32 %v2381_v4, %v382_v7 }
 0x360   :  { %573 = vrot.lane.b32.xlu1 %v3075_v6, %s2936_s29  ;;  %v449_v18 = vrot.slane %v3075_v6, %v3107_v26 }
 0x361   :  { %3928 = vst [vmem:[#allocation5_spill] sm:$0xff] %v3077_v8  ;;  %571 = vrot.lane.b32.xlu0 %v3077_v8, %s2936_s29  ;;  %v400_v27 = vrot.slane %v3077_v8, %v3107_v26  ;;  %v393_v32 = vcombine.high %v3077_v8, %v3077_v8 }
 0x363   :  { %v408_v28 = vcombine.high %v400_v27, %v400_v27  ;;  %v416_v29 = vrot.slane %v400_v27, %v3107_v26  ;;  %v407_v42 = vrot.slane %v393_v32, %v3107_v26  ;;  %v465_v27 = vrot.slane %v449_v18, %v3107_v26 }
 0x365   :  { %v430_v31 = vrot.slane %v408_v28, %v3107_v26  ;;  %v494_v33 = vrot.slane %v416_v29, %v3112_v30  ;;  %v438_v35 = vcombine.high %v416_v29, %v416_v29  ;;  %v423_v54 = vrot.slane %v407_v42, %v3107_v26 }
 0x366   :  { %v409_v55 = vcombine.high %v407_v42, %v407_v42  ;;  %v457_v28 = vcombine.high %v449_v18, %v449_v18 }
 0x367   :  { %v498_v34 = vrot.slane %v430_v31, %v3112_v30  ;;  %v502_v44 = vrot.slane %v438_v35, %v3112_v30  ;;  %v440_v45 = vcombine.high %v430_v31, %v430_v31  ;;  %v510_v62 = vrot.slane %v423_v54, %v3112_v30 }
 0x368   :  { %v437_v63 = vrot.slane %v409_v55, %v3107_v26  ;;  %v439_v9 = vcombine.high %v423_v54, %v423_v54 }
 0x369   :  { %v506_v53 = vrot.slane %v440_v45, %v3112_v30 }
 0x36a   :  { %v514_v7 = vrot.slane %v437_v63, %v3112_v30  ;;  %v518_v16 = vrot.slane %v439_v9, %v3112_v30  ;;  %v441_v17 = vcombine.high %v437_v63, %v437_v63 }
 0x36c   :  { %v522_v25 = vrot.slane %v441_v17, %v3112_v30 }
 0x3d2   :  { %v3119_v36 = vpop.permute.xlu1 %573 }
 0x3d3   :  { %v3121_v37 = vpop.permute.xlu0 %571  ;;  %v578_v38 = vadd.f32 %v3119_v36, %v494_v33  ;;  %v580_v39 = vadd.f32 %v3119_v36, %v498_v34  ;;  %v582_v49 = vadd.f32 %v3119_v36, %v502_v44  ;;  %v584_v58 = vadd.f32 %v3119_v36, %v506_v53 }
 0x3d4   :  { %v577_v40 = vadd.f32 %v3121_v37, %v494_v33  ;;  %v579_v41 = vadd.f32 %v3121_v37, %v498_v34  ;;  %v581_v52 = vadd.f32 %v3121_v37, %v502_v44  ;;  %v583_v61 = vadd.f32 %v3121_v37, %v506_v53 }
 0x3d5   :  { %vm610_vm2 = vcmp.gt.f32.partialorder %v578_v38, 0.0  ;;  %v642_v43 = vmul.f32 0.2, %v578_v38  ;;  %v644_v48 = vmul.f32 0.2, %v580_v39  ;;  %vm612_vm4 = vcmp.gt.f32.partialorder %v580_v39, 0.0 }
 0x3d6   :  { %vm609_vm3 = vcmp.gt.f32.partialorder %v577_v40, 0.0  ;;  %v641_v46 = vmul.f32 0.2, %v577_v40  ;;  %v643_v51 = vmul.f32 0.2, %v579_v41  ;;  %vm611_vm5 = vcmp.gt.f32.partialorder %v579_v41, 0.0 }
 0x3d7   :  { %v674_v47 = vsel %vm610_vm2, %v578_v38, %v642_v43  ;;  %v676_v56 = vsel %vm612_vm4, %v580_v39, %v644_v48  ;;  %v646_v57 = vmul.f32 0.2, %v582_v49  ;;  %vm614_vm6 = vcmp.gt.f32.partialorder %v582_v49, 0.0 }
 0x3d8   :  { %779 = vrot.lane.b32.xlu0 %v674_v47, %s2936_s29  ;;  %v673_v50 = vsel %vm609_vm3, %v577_v40, %v641_v46  ;;  %v675_v59 = vsel %vm611_vm5, %v579_v41, %v643_v51  ;;  %v645_v60 = vmul.f32 0.2, %v581_v52  ;;  %vm613_vm7 = vcmp.gt.f32.partialorder %v581_v52, 0.0 }
 0x3d9   :  { %777 = vrot.lane.b32.xlu1 %v673_v50, %s2936_s29  ;;  %v678_v0 = vsel %vm614_vm6, %v582_v49, %v646_v57  ;;  %v648_v1 = vmul.f32 0.2, %v584_v58  ;;  %v586_v2 = vadd.f32 %v3119_v36, %v510_v62  ;;  %vm616_vm8 = vcmp.gt.f32.partialorder %v584_v58, 0.0 }
 0x3da   :  { %v677_v3 = vsel %vm613_vm7, %v581_v52, %v645_v60  ;;  %v647_v4 = vmul.f32 0.2, %v583_v61  ;;  %v585_v5 = vadd.f32 %v3121_v37, %v510_v62  ;;  %vm615_vm9 = vcmp.gt.f32.partialorder %v583_v61, 0.0 }
 0x3db   :  { %v680_v10 = vsel %vm616_vm8, %v584_v58, %v648_v1  ;;  %v650_v11 = vmul.f32 0.2, %v586_v2  ;;  %v588_v12 = vadd.f32 %v3119_v36, %v514_v7  ;;  %vm618_vm10 = vcmp.gt.f32.partialorder %v586_v2, 0.0 }
 0x3dc   :  { %783 = vrot.lane.b32.xlu0 %v676_v56, %s2936_s29  ;;  %v679_v13 = vsel %vm615_vm9, %v583_v61, %v647_v4  ;;  %v649_v14 = vmul.f32 0.2, %v585_v5  ;;  %v587_v15 = vadd.f32 %v3121_v37, %v514_v7  ;;  %vm617_vm11 = vcmp.gt.f32.partialorder %v585_v5, 0.0 }
 0x3dd   :  { %781 = vrot.lane.b32.xlu1 %v675_v59, %s2936_s29  ;;  %v682_v19 = vsel %vm618_vm10, %v586_v2, %v650_v11  ;;  %v652_v20 = vmul.f32 0.2, %v588_v12  ;;  %v590_v21 = vadd.f32 %v3119_v36, %v518_v16  ;;  %vm620_vm12 = vcmp.gt.f32.partialorder %v588_v12, 0.0 }
 0x3de   :  { %v681_v22 = vsel %vm617_vm11, %v585_v5, %v649_v14  ;;  %v651_v23 = vmul.f32 0.2, %v587_v15  ;;  %v589_v24 = vadd.f32 %v3121_v37, %v518_v16  ;;  %vm619_vm13 = vcmp.gt.f32.partialorder %v587_v15, 0.0 }
 0x3df   :  { %v684_v29 = vsel %vm620_vm12, %v588_v12, %v652_v20  ;;  %v654_v31 = vmul.f32 0.2, %v590_v21  ;;  %v592_v32 = vadd.f32 %v3119_v36, %v522_v25  ;;  %vm622_vm14 = vcmp.gt.f32.partialorder %v590_v21, 0.0 }
 0x3e0   :  { %787 = vrot.lane.b32.xlu0 %v678_v0, %s2936_s29  ;;  %v683_v33 = vsel %vm619_vm13, %v587_v15, %v651_v23  ;;  %v653_v34 = vmul.f32 0.2, %v589_v24  ;;  %v591_v35 = vadd.f32 %v3121_v37, %v522_v25  ;;  %vm621_vm15 = vcmp.gt.f32.partialorder %v589_v24, 0.0 }
 0x3e1   :  { %785 = vrot.lane.b32.xlu1 %v677_v3, %s2936_s29  ;;  %v526_v38 = vrot.slane %v465_v27, %v3112_v30  ;;  %v479_v39 = vrot.slane %v457_v28, %v3107_v26  ;;  %v686_v40 = vsel %vm622_vm14, %v590_v21, %v654_v31  ;;  %v656_v41 = vmul.f32 0.2, %v592_v32 }
 0x3e2   :  { %v685_v43 = vsel %vm621_vm15, %v589_v24, %v653_v34  ;;  %vm624_vm0 = vcmp.gt.f32.partialorder %v592_v32, 0.0  ;;  %v655_v44 = vmul.f32 0.2, %v591_v35  ;;  %vm623_vm2 = vcmp.gt.f32.partialorder %v591_v35, 0.0 }
 0x3e3   :  { %v594_v42 = vadd.f32 %v3119_v36, %v526_v38  ;;  %v593_v45 = vadd.f32 %v3121_v37, %v526_v38  ;;  %v530_v46 = vrot.slane %v479_v39, %v3112_v30  ;;  %v487_v47 = vcombine.high %v465_v27, %v465_v27 }
 0x3e4   :  { %791 = vrot.lane.b32.xlu0 %v680_v10, %s2936_s29  ;;  %v442_v48 = vcombine.high %v3075_v6, %v3075_v6  ;;  %v688_v49 = vsel %vm624_vm0, %v592_v32, %v656_v41  ;;  %v687_v52 = vsel %vm623_vm2, %v591_v35, %v655_v44  ;;  %v489_v56 = vcombine.high %v479_v39, %v479_v39 }
 0x3e5   :  { %789 = vrot.lane.b32.xlu1 %v679_v13, %s2936_s29  ;;  %v658_v50 = vmul.f32 0.2, %v594_v42  ;;  %v596_v51 = vadd.f32 %v3119_v36, %v530_v46  ;;  %vm626_vm3 = vcmp.gt.f32.partialorder %v594_v42, 0.0  ;;  %v657_v53 = vmul.f32 0.2, %v593_v45 }
 0x3e6   :  { %v595_v54 = vadd.f32 %v3121_v37, %v530_v46  ;;  %vm625_vm4 = vcmp.gt.f32.partialorder %v593_v45, 0.0  ;;  %v534_v55 = vrot.slane %v487_v47, %v3112_v30  ;;  %v456_v57 = vrot.slane %v442_v48, %v3107_v26 }
 0x3e7   :  { %v690_v58 = vsel %vm626_vm3, %v594_v42, %v658_v50  ;;  %v660_v59 = vmul.f32 0.2, %v596_v51  ;;  %v689_v61 = vsel %vm625_vm4, %v593_v45, %v657_v53  ;;  %vm628_vm5 = vcmp.gt.f32.partialorder %v596_v51, 0.0 }
 0x3e8   :  { %795 = vrot.lane.b32.xlu0 %v682_v19, %s2936_s29  ;;  %v598_v60 = vadd.f32 %v3119_v36, %v534_v55  ;;  %v659_v62 = vmul.f32 0.2, %v595_v54  ;;  %v597_v63 = vadd.f32 %v3121_v37, %v534_v55  ;;  %vm627_vm6 = vcmp.gt.f32.partialorder %v595_v54, 0.0 }
 0x3e9   :  { %793 = vrot.lane.b32.xlu1 %v681_v22, %s2936_s29  ;;  %v538_v0 = vrot.slane %v489_v56, %v3112_v30  ;;  %v472_v1 = vrot.slane %v456_v57, %v3107_v26  ;;  %v458_v2 = vcombine.high %v456_v57, %v456_v57  ;;  %v692_v3 = vsel %vm628_vm5, %v596_v51, %v660_v59 }
 0x3ea   :  { %v662_v4 = vmul.f32 0.2, %v598_v60  ;;  %v691_v7 = vsel %vm627_vm6, %v595_v54, %v659_v62  ;;  %vm630_vm7 = vcmp.gt.f32.partialorder %v598_v60, 0.0  ;;  %v661_v9 = vmul.f32 0.2, %v597_v63 }
 0x3eb   :  { %v600_v5 = vadd.f32 %v3119_v36, %v538_v0  ;;  %v599_v10 = vadd.f32 %v3121_v37, %v538_v0  ;;  %vm629_vm8 = vcmp.gt.f32.partialorder %v597_v63, 0.0  ;;  %v542_v11 = vrot.slane %v472_v1, %v3112_v30 }
 0x3ec   :  { %799 = vrot.lane.b32.xlu0 %v684_v29, %s2936_s29  ;;  %v486_v12 = vrot.slane %v458_v2, %v3107_v26  ;;  %v694_v13 = vsel %vm630_vm7, %v598_v60, %v662_v4  ;;  %v693_v16 = vsel %vm629_vm8, %v597_v63, %v661_v9  ;;  %v488_v20 = vcombine.high %v472_v1, %v472_v1 }
 0x3ed   :  { %797 = vrot.lane.b32.xlu1 %v683_v33, %s2936_s29  ;;  %v664_v14 = vmul.f32 0.2, %v600_v5  ;;  %v602_v15 = vadd.f32 %v3119_v36, %v542_v11  ;;  %vm632_vm9 = vcmp.gt.f32.partialorder %v600_v5, 0.0  ;;  %v663_v17 = vmul.f32 0.2, %v599_v10 }
 0x3ee   :  { %v601_v18 = vadd.f32 %v3121_v37, %v542_v11  ;;  %vm631_vm10 = vcmp.gt.f32.partialorder %v599_v10, 0.0  ;;  %v546_v19 = vrot.slane %v486_v12, %v3112_v30  ;;  %v550_v27 = vrot.slane %v488_v20, %v3112_v30 }
 0x3ef   :  { %v696_v21 = vsel %vm632_vm9, %v600_v5, %v664_v14  ;;  %v666_v22 = vmul.f32 0.2, %v602_v15  ;;  %v695_v23 = vsel %vm631_vm10, %v599_v10, %v663_v17  ;;  %vm634_vm11 = vcmp.gt.f32.partialorder %v602_v15, 0.0 }
 0x3f0   :  { %803 = vrot.lane.b32.xlu0 %v686_v40, %s2936_s29  ;;  %v604_v26 = vadd.f32 %v3119_v36, %v546_v19  ;;  %v665_v24 = vmul.f32 0.2, %v601_v18  ;;  %v603_v25 = vadd.f32 %v3121_v37, %v546_v19  ;;  %vm633_vm12 = vcmp.gt.f32.partialorder %v601_v18, 0.0  ;;  %v1565_v19 = vld [vmem:[%s3914_s8 + $0x8] sm:$0xff] }
 0x3f1   :  { %801 = vrot.lane.b32.xlu1 %v685_v43, %s2936_s29  ;;  %v490_v28 = vcombine.high %v486_v12, %v486_v12  ;;  %v698_v29 = vsel %vm634_vm11, %v602_v15, %v666_v22  ;;  %v606_v32 = vadd.f32 %v3119_v36, %v550_v27  ;;  %v605_v35 = vadd.f32 %v3121_v37, %v550_v27  ;;  %v713_v22 = vld [vmem:[%s3908_s2] sm:$0xff]  ;;  %v716_v27 = vld [vmem:[%s3908_s2 + $0x18] sm:$0xff] }
 0x3f2   :  { %v668_v31 = vmul.f32 0.2, %v604_v26  ;;  %v697_v33 = vsel %vm633_vm12, %v601_v18, %v665_v24  ;;  %vm636_vm13 = vcmp.gt.f32.partialorder %v604_v26, 0.0  ;;  %v667_v34 = vmul.f32 0.2, %v603_v25  ;;  %v1564_v18 = vld [vmem:[%s3914_s8] sm:$0xff] }
 0x3f3   :  { %vm635_vm14 = vcmp.gt.f32.partialorder %v603_v25, 0.0  ;;  %v554_v38 = vrot.slane %v490_v28, %v3112_v30  ;;  %v670_v40 = vmul.f32 0.2, %v606_v32  ;;  %vm638_vm15 = vcmp.gt.f32.partialorder %v606_v32, 0.0 }
 0x3f4   :  { %807 = vrot.lane.b32.xlu0 %v688_v49, %s2936_s29  ;;  %v700_v39 = vsel %vm636_vm13, %v604_v26, %v668_v31  ;;  %v699_v42 = vsel %vm635_vm14, %v603_v25, %v667_v34  ;;  %v669_v43 = vmul.f32 0.2, %v605_v35  ;;  %vm637_vm0 = vcmp.gt.f32.partialorder %v605_v35, 0.0 }
 0x3f5   :  { %805 = vrot.lane.b32.xlu1 %v687_v52, %s2936_s29  ;;  %v608_v41 = vadd.f32 %v3119_v36, %v554_v38  ;;  %v607_v44 = vadd.f32 %v3121_v37, %v554_v38  ;;  %v702_v45 = vsel %vm638_vm15, %v606_v32, %v670_v40  ;;  %vm841_vm4 = vcmask 523264  }
 0x3f6   :  { %v701_v47 = vsel %vm637_vm0, %v605_v35, %v669_v43  ;;  %v2756_v20 = vpack.c.bf16 %v1565_v19, %v1564_v18  ;;  %vm1131_vm5 = vcmask 130048   ;;  %v723_v18 = vld [vmem:[%s3908_s2 + $0x50] sm:$0xff]  ;;  %vm2086_vm6 = vcmask 1041409  }
 0x3f7   :  { %v672_v46 = vmul.f32 0.2, %v608_v41  ;;  %vm640_vm2 = vcmp.gt.f32.partialorder %v608_v41, 0.0  ;;  %v671_v30 = vmul.f32 0.2, %v607_v44  ;;  %vm639_vm3 = vcmp.gt.f32.partialorder %v607_v44, 0.0 }
 0x3f8   :  { %811 = vrot.lane.b32.xlu0 %v690_v58, %s2936_s29  ;;  %2757 = vmatprep.subr.bf16.mxu0 %v2756_v20  ;;  %vm2088_vm7 = vcmask 1042434   ;;  %vm2090_vm8 = vcmask 1043459   ;;  %vm2092_vm9 = vcmask 1044484   ;;  %vm2094_vm10 = vcmask 1045509  }
 0x3f9   :  { %809 = vrot.lane.b32.xlu1 %v689_v61, %s2936_s29  ;;  %v704_v36 = vsel %vm640_vm2, %v608_v41, %v672_v46  ;;  %v703_v48 = vsel %vm639_vm3, %v607_v44, %v671_v30  ;;  %2759 = vmatpush3.bf16.msra.mxu0 %v2756_v20  ;;  %vm2096_vm11 = vcmask 1046534   ;;  %vm2098_vm12 = vcmask 1047559  }
 0x3fc   :  { %815 = vrot.lane.b32.xlu0 %v692_v3, %s2936_s29 }
 0x3fd   :  { %813 = vrot.lane.b32.xlu1 %v691_v7, %s2936_s29 }
 0x400   :  { %819 = vrot.lane.b32.xlu0 %v694_v13, %s2936_s29 }
 0x401   :  { %817 = vrot.lane.b32.xlu1 %v693_v16, %s2936_s29 }
 0x404   :  { %823 = vrot.lane.b32.xlu0 %v696_v21, %s2936_s29  ;;  %v714_v21 = vld [vmem:[%s3908_s2 + $0x8] sm:$0xff] }
 0x405   :  { %821 = vrot.lane.b32.xlu1 %v695_v23, %s2936_s29 }
 0x408   :  { %827 = vrot.lane.b32.xlu0 %v698_v29, %s2936_s29  ;;  %v715_v29 = vld [vmem:[%s3908_s2 + $0x10] sm:$0xff] }
 0x409   :  { %825 = vrot.lane.b32.xlu1 %v697_v33, %s2936_s29 }
 0x40c   :  { %831 = vrot.lane.b32.xlu0 %v700_v39, %s2936_s29  ;;  %v718_v39 = vld [vmem:[%s3908_s2 + $0x28] sm:$0xff] }
 0x40d   :  { %829 = vrot.lane.b32.xlu1 %v699_v42, %s2936_s29  ;;  %v717_v42 = vld [vmem:[%s3908_s2 + $0x20] sm:$0xff] }
 0x410   :  { %835 = vrot.lane.b32.xlu0 %v702_v45, %s2936_s29 }
 0x411   :  { %833 = vrot.lane.b32.xlu1 %v701_v47, %s2936_s29 }
 0x414   :  { %839 = vrot.lane.b32.xlu0 %v704_v36, %s2936_s29 }
 0x415   :  { %837 = vrot.lane.b32.xlu1 %v703_v48, %s2936_s29  ;;  %v720_v48 = vld [vmem:[%s3908_s2 + $0x38] sm:$0xff] }
 0x44a   :  { %v780_v37 = vpop.permute.xlu0 %779 }
 0x44b   :  { %v778_v49 = vpop.permute.xlu1 %777 }
 0x44c   :  { %2602 = vmatprep.mubr.msk.f32.mxu1 %vm841_vm4, %v778_v49 }
 0x44d   :  { %2603 = vmatmul.mubr.msk.f32.vlgmr.msra.gmra.mrb[2].mxu1 %vm841_vm4, %v780_v37 }
 0x44e   :  { %v784_v50 = vpop.permute.xlu0 %783 }
 0x44f   :  { %v782_v51 = vpop.permute.xlu1 %781 }
 0x450   :  { %2605 = vmatprep.mubr.msk.f32.mxu1 %vm841_vm4, %v782_v51  ;;  %v719_v51 = vld [vmem:[%s3908_s2 + $0x30] sm:$0xff] }
 0x451   :  { %2606 = vmatmul.mubr.msk.f32.gmra.mrb[4].mxu1 %vm841_vm4, %v784_v50 }
 0x452   :  { %v788_v52 = vpop.permute.xlu0 %787 }
 0x453   :  { %v786_v53 = vpop.permute.xlu1 %785 }
 0x454   :  { %2608 = vmatprep.mubr.msk.f32.mxu1 %vm841_vm4, %v786_v53 }
 0x455   :  { %2609 = vmatmul.mubr.msk.f32.gmra.mrb[6].mxu1 %vm841_vm4, %v788_v52 }
 0x456   :  { %v792_v54 = vpop.permute.xlu0 %791 }
 0x457   :  { %v790_v55 = vpop.permute.xlu1 %789 }
 0x458   :  { %2611 = vmatprep.mubr.msk.f32.mxu1 %vm841_vm4, %v790_v55 }
 0x459   :  { %2612 = vmatmul.mubr.msk.f32.gmra.mrb[8].mxu1 %vm841_vm4, %v792_v54 }
 0x45a   :  { %v796_v56 = vpop.permute.xlu0 %795 }
 0x45b   :  { %v794_v57 = vpop.permute.xlu1 %793 }
 0x45c   :  { %2614 = vmatprep.mubr.msk.f32.mxu1 %vm841_vm4, %v794_v57 }
 0x45d   :  { %2615 = vmatmul.mubr.msk.f32.gmra.mrb[10].mxu1 %vm841_vm4, %v796_v56 }
 0x45e   :  { %v800_v58 = vpop.permute.xlu0 %799 }
 0x45f   :  { %v798_v59 = vpop.permute.xlu1 %797 }
 0x460   :  { %2617 = vmatprep.mubr.msk.f32.mxu1 %vm841_vm4, %v798_v59 }
 0x461   :  { %2618 = vmatmul.mubr.msk.f32.gmra.mrb[12].mxu1 %vm841_vm4, %v800_v58 }
 0x462   :  { %v804_v60 = vpop.permute.xlu0 %803 }
 0x463   :  { %v802_v61 = vpop.permute.xlu1 %801 }
 0x464   :  { %2620 = vmatprep.mubr.msk.f32.mxu1 %vm841_vm4, %v802_v61 }
 0x465   :  { %2621 = vmatmul.mubr.msk.f32.gmra.mrb[14].mxu1 %vm841_vm4, %v804_v60 }
 0x466   :  { %v808_v62 = vpop.permute.xlu0 %807 }
 0x467   :  { %v806_v63 = vpop.permute.xlu1 %805 }
 0x468   :  { %2623 = vmatprep.mubr.msk.f32.mxu1 %vm841_vm4, %v806_v63 }
 0x469   :  { %2624 = vmatmul.mubr.msk.f32.gmra.mrb[16].mxu1 %vm841_vm4, %v808_v62 }
 0x46a   :  { %v812_v0 = vpop.permute.xlu0 %811 }
 0x46b   :  { %v810_v1 = vpop.permute.xlu1 %809 }
 0x46c   :  { %2626 = vmatprep.mubr.msk.f32.mxu1 %vm841_vm4, %v810_v1  ;;  %v721_v1 = vld [vmem:[%s3908_s2 + $0x40] sm:$0xff] }
 0x46d   :  { %2627 = vmatmul.mubr.msk.f32.gmra.mrb[18].mxu1 %vm841_vm4, %v812_v0  ;;  %v722_v0 = vld [vmem:[%s3908_s2 + $0x48] sm:$0xff] }
 0x46e   :  { %v816_v2 = vpop.permute.xlu0 %815 }
 0x46f   :  { %v814_v3 = vpop.permute.xlu1 %813 }
 0x470   :  { %2629 = vmatprep.mubr.msk.f32.mxu1 %vm841_vm4, %v814_v3 }
 0x471   :  { %2630 = vmatmul.mubr.msk.f32.gmra.mrb[20].mxu1 %vm841_vm4, %v816_v2 }
 0x472   :  { %v820_v4 = vpop.permute.xlu0 %819 }
 0x473   :  { %v818_v5 = vpop.permute.xlu1 %817 }
 0x474   :  { %2632 = vmatprep.mubr.msk.f32.mxu1 %vm841_vm4, %v818_v5 }
 0x475   :  { %2633 = vmatmul.mubr.msk.f32.gmra.mrb[22].mxu1 %vm841_vm4, %v820_v4 }
 0x476   :  { %v824_v7 = vpop.permute.xlu0 %823 }
 0x477   :  { %v822_v9 = vpop.permute.xlu1 %821 }
 0x478   :  { %2635 = vmatprep.mubr.msk.f32.mxu1 %vm841_vm4, %v822_v9 }
 0x479   :  { %2636 = vmatmul.mubr.msk.f32.gmra.mrb[24].mxu1 %vm841_vm4, %v824_v7 }
 0x47a   :  { %v828_v10 = vpop.permute.xlu0 %827 }
 0x47b   :  { %v826_v11 = vpop.permute.xlu1 %825 }
 0x47c   :  { %2638 = vmatprep.mubr.msk.f32.mxu1 %vm841_vm4, %v826_v11 }
 0x47d   :  { %2639 = vmatmul.mubr.msk.f32.gmra.mrb[26].mxu1 %vm841_vm4, %v828_v10 }
 0x47e   :  { %v832_v12 = vpop.permute.xlu0 %831 }
 0x47f   :  { %v830_v13 = vpop.permute.xlu1 %829 }
 0x480   :  { %2641 = vmatprep.mubr.msk.f32.mxu1 %vm841_vm4, %v830_v13 }
 0x481   :  { %2642 = vmatmul.mubr.msk.f32.gmra.mrb[28].mxu1 %vm841_vm4, %v832_v12 }
 0x482   :  { %v836_v14 = vpop.permute.xlu0 %835 }
 0x483   :  { %v834_v15 = vpop.permute.xlu1 %833 }
 0x484   :  { %2644 = vmatprep.mubr.msk.f32.mxu1 %vm841_vm4, %v834_v15 }
 0x485   :  { %2645 = vmatmul.mubr.msk.f32.gmra.mrb[30].mxu1 %vm841_vm4, %v836_v14 }
 0x486   :  { %v840_v17 = vpop.permute.xlu0 %839 }
 0x487   :  { %v838_v16 = vpop.permute.xlu1 %837 }
 0x488   :  { %2647 = vmatprep.mubr.msk.f32.mxu1 %vm841_vm4, %v838_v16 }
 0x489   :  { %2648 = vmatmul.mubr.msk.f32.gmra.mrb[32].mxu1 %vm841_vm4, %v840_v17  ;;  %v724_v17 = vld [vmem:[%s3908_s2 + $0x58] sm:$0xff] }
 0x520   :  { %v2604_v26 = vpop.f32.mrb[2].mxu1 }
 0x521   :  { %v978_v23 = vadd.f32 %v2604_v26, %v714_v21  ;;  %v972_v24 = vpop.f32.mrb[3].mxu1 }
 0x522   :  { %v973_v25 = vadd.f32 %v972_v24, %v713_v22 }
 0x523   :  { %v1133_v28 = vsel %vm1131_vm5, %v978_v23, -inf }
 0x524   :  { %v1132_v31 = vsel %vm1131_vm5, %v973_v25, -inf  ;;  %v2607_v32 = vpop.f32.mrb[4].mxu1 }
 0x525   :  { %v1134_v33 = vmax.f32 %v1132_v31, %v1133_v28  ;;  %v3265_v34 = vadd.f32 %v2607_v32, %v716_v27  ;;  %v982_v35 = vpop.f32.mrb[5].mxu1 }
 0x526   :  { %v3267_v38 = vadd.f32 %v982_v35, %v715_v29 }
 0x527   :  { %v1135_v40 = vrot.slane %v1134_v33, 4  ;;  %v1142_v41 = vsel %vm1131_vm5, %v3265_v34, -inf }
 0x528   :  { %v1141_v43 = vsel %vm1131_vm5, %v3267_v38, -inf  ;;  %v2610_v44 = vpop.f32.mrb[6].mxu1 }
 0x529   :  { %v1136_v45 = vmax.f32 %v1134_v33, %v1135_v40  ;;  %v1143_v46 = vmax.f32 %v1141_v43, %v1142_v41  ;;  %v3279_v47 = vadd.f32 %v2610_v44, %v718_v39  ;;  %v992_v30 = vpop.f32.mrb[7].mxu1  ;;  %v726_v40 = vld [vmem:[%s3908_s2 + $0x68] sm:$0xff] }
 0x52a   :  { %v3281_v36 = vadd.f32 %v992_v30, %v717_v42 }
 0x52b   :  { %v1137_v37 = vrot.slane %v1136_v45, 2  ;;  %v1144_v49 = vrot.slane %v1143_v46, 4  ;;  %v1151_v50 = vsel %vm1131_vm5, %v3279_v47, -inf }
 0x52c   :  { %v1150_v52 = vsel %vm1131_vm5, %v3281_v36, -inf  ;;  %v2613_v53 = vpop.f32.mrb[8].mxu1 }
 0x52d   :  { %v1138_v54 = vmax.f32 %v1136_v45, %v1137_v37  ;;  %v1145_v55 = vmax.f32 %v1143_v46, %v1144_v49  ;;  %v1152_v56 = vmax.f32 %v1150_v52, %v1151_v50  ;;  %v3293_v57 = vadd.f32 %v2613_v53, %v720_v48  ;;  %v1002_v58 = vpop.f32.mrb[9].mxu1  ;;  %v725_v45 = vld [vmem:[%s3908_s2 + $0x60] sm:$0xff] }
 0x52e   :  { %v3295_v59 = vadd.f32 %v1002_v58, %v719_v51 }
 0x52f   :  { %v1139_v60 = vrot.slane %v1138_v54, 1  ;;  %v1146_v61 = vrot.slane %v1145_v55, 2  ;;  %v1153_v62 = vrot.slane %v1152_v56, 4  ;;  %v1160_v63 = vsel %vm1131_vm5, %v3293_v57, -inf }
 0x530   :  { %v1159_v2 = vsel %vm1131_vm5, %v3295_v59, -inf  ;;  %v2616_v3 = vpop.f32.mrb[10].mxu1 }
 0x531   :  { %v1140_v4 = vmax.f32 %v1138_v54, %v1139_v60  ;;  %v1147_v5 = vmax.f32 %v1145_v55, %v1146_v61  ;;  %v1154_v7 = vmax.f32 %v1152_v56, %v1153_v62  ;;  %v1161_v9 = vmax.f32 %v1159_v2, %v1160_v63  ;;  %v1012_v10 = vpop.f32.mrb[11].mxu1  ;;  %v728_v60 = vld [vmem:[%s3908_s2 + $0x78] sm:$0xff]  ;;  %v727_v62 = vld [vmem:[%s3908_s2 + $0x70] sm:$0xff] }
 0x532   :  { %v3307_v11 = vadd.f32 %v2616_v3, %v722_v0  ;;  %v3309_v12 = vadd.f32 %v1012_v10, %v721_v1 }
 0x533   :  { %v1276_v13 = vsub.f32 %v973_v25, %v1140_v4  ;;  %v1277_v14 = vsub.f32 %v978_v23, %v1140_v4  ;;  %v1148_v15 = vrot.slane %v1147_v5, 1  ;;  %v1155_v16 = vrot.slane %v1154_v7, 2 }
 0x534   :  { %v1162_v19 = vrot.slane %v1161_v9, 4  ;;  %v1169_v20 = vsel %vm1131_vm5, %v3307_v11, -inf  ;;  %v1168_v21 = vsel %vm1131_vm5, %v3309_v12, -inf  ;;  %v2619_v22 = vpop.f32.mrb[12].mxu1 }
 0x535   :  { %v1308_v26 = vmul.f32 1.442695, %v1276_v13  ;;  %v1310_v23 = vmul.f32 1.442695, %v1277_v14  ;;  %v1149_v24 = vmax.f32 %v1147_v5, %v1148_v15  ;;  %v1156_v25 = vmax.f32 %v1154_v7, %v1155_v16  ;;  %v1022_v27 = vpop.f32.mrb[13].mxu1 }
 0x536   :  { %v1163_v28 = vmax.f32 %v1161_v9, %v1162_v19  ;;  %v1170_v29 = vmax.f32 %v1168_v21, %v1169_v20  ;;  %v3321_v31 = vadd.f32 %v2619_v22, %v724_v17  ;;  %v3323_v32 = vadd.f32 %v1022_v27, %v723_v18 }
 0x537   :  { %2803 = vpow2.f32 %v1308_v26  ;;  %v1278_v33 = vsub.f32 %v3267_v38, %v1149_v24  ;;  %v1279_v35 = vsub.f32 %v3265_v34, %v1149_v24  ;;  %v1157_v39 = vrot.slane %v1156_v25, 1 }
 0x538   :  { %2805 = vpow2.f32 %v1310_v23  ;;  %v1164_v41 = vrot.slane %v1163_v28, 2  ;;  %v1171_v42 = vrot.slane %v1170_v29, 4  ;;  %v1178_v43 = vsel %vm1131_vm5, %v3321_v31, -inf  ;;  %v2622_v44 = vpop.f32.mrb[14].mxu1 }
 0x539   :  { %v1312_v46 = vmul.f32 1.442695, %v1278_v33  ;;  %v1314_v38 = vmul.f32 1.442695, %v1279_v35  ;;  %v1158_v30 = vmax.f32 %v1156_v25, %v1157_v39  ;;  %v1177_v34 = vsel %vm1131_vm5, %v3323_v32, -inf  ;;  %v1032_v48 = vpop.f32.mrb[15].mxu1 }
 0x53a   :  { %v1165_v37 = vmax.f32 %v1163_v28, %v1164_v41  ;;  %v1172_v49 = vmax.f32 %v1170_v29, %v1171_v42  ;;  %v1179_v50 = vmax.f32 %v1177_v34, %v1178_v43  ;;  %v3337_v51 = vadd.f32 %v2622_v44, %v726_v40  ;;  %v730_v44 = vld [vmem:[%s3908_s2 + $0x88] sm:$0xff] }
 0x53b   :  { %2807 = vpow2.f32 %v1312_v46  ;;  %v1280_v52 = vsub.f32 %v3281_v36, %v1158_v30  ;;  %v1281_v53 = vsub.f32 %v3279_v47, %v1158_v30  ;;  %v3341_v54 = vadd.f32 %v1032_v48, %v725_v45 }
 0x53c   :  { %2809 = vpow2.f32 %v1314_v38  ;;  %v1166_v55 = vrot.slane %v1165_v37, 1  ;;  %v1173_v56 = vrot.slane %v1172_v49, 2  ;;  %v1180_v58 = vrot.slane %v1179_v50, 4  ;;  %v2625_v61 = vpop.f32.mrb[16].mxu1 }
 0x53d   :  { %v1316_v63 = vmul.f32 1.442695, %v1280_v52  ;;  %v1318_v0 = vmul.f32 1.442695, %v1281_v53  ;;  %v1187_v47 = vsel %vm1131_vm5, %v3337_v51, -inf  ;;  %v1186_v36 = vsel %vm1131_vm5, %v3341_v54, -inf }
 0x53e   :  { %v1167_v1 = vmax.f32 %v1165_v37, %v1166_v55  ;;  %v1174_v2 = vmax.f32 %v1172_v49, %v1173_v56  ;;  %v1181_v3 = vmax.f32 %v1179_v50, %v1180_v58  ;;  %v1188_v4 = vmax.f32 %v1186_v36, %v1187_v47  ;;  %v1042_v5 = vpop.f32.mrb[17].mxu1 }
 0x53f   :  { %2811 = vpow2.f32 %v1316_v63  ;;  %v3353_v7 = vadd.f32 %v2625_v61, %v728_v60  ;;  %v3355_v9 = vadd.f32 %v1042_v5, %v727_v62 }
 0x540   :  { %2813 = vpow2.f32 %v1318_v0  ;;  %v1282_v10 = vsub.f32 %v3295_v59, %v1167_v1  ;;  %v1283_v13 = vsub.f32 %v3293_v57, %v1167_v1  ;;  %v1175_v14 = vrot.slane %v1174_v2, 1  ;;  %v2628_v15 = vpop.f32.mrb[18].mxu1 }
 0x541   :  { %v3359_v16 = vpop.eup %2803  ;;  %v1182_v17 = vrot.slane %v1181_v3, 2  ;;  %v1189_v18 = vrot.slane %v1188_v4, 4  ;;  %v1196_v19 = vsel %vm1131_vm5, %v3353_v7, -inf  ;;  %v1195_v20 = vsel %vm1131_vm5, %v3355_v9, -inf  ;;  %v3365_v21 = vpop.f32.mrb[19].mxu1 }
 0x542   :  { %v3367_v22 = vpop.eup %2805  ;;  %v1372_v59 = vsel %vm1131_vm5, %v3359_v16, 0.0  ;;  %v1320_v57 = vmul.f32 1.442695, %v1282_v10  ;;  %v1322_v26 = vmul.f32 1.442695, %v1283_v13  ;;  %v1176_v23 = vmax.f32 %v1174_v2, %v1175_v14  ;;  %v729_v14 = vld [vmem:[%s3908_s2 + $0x80] sm:$0xff] }
 0x543   :  { %v1373_v24 = vsel %vm1131_vm5, %v3367_v22, 0.0  ;;  %v1183_v25 = vmax.f32 %v1181_v3, %v1182_v17  ;;  %v1190_v27 = vmax.f32 %v1188_v4, %v1189_v18  ;;  %v1197_v28 = vmax.f32 %v1195_v20, %v1196_v19 }
 0x544   :  { %v1374_v29 = vadd.f32 %v1373_v24, %v1372_v59  ;;  %2815 = vpow2.f32 %v1320_v57  ;;  %v1284_v33 = vsub.f32 %v3309_v12, %v1176_v23  ;;  %v1285_v35 = vsub.f32 %v3307_v11, %v1176_v23  ;;  %v3375_v39 = vpop.f32.mrb[20].mxu1  ;;  %v732_v24 = vld [vmem:[%s3908_s2 + $0x98] sm:$0xff] }
 0x545   :  { %v3377_v40 = vpop.eup %2807  ;;  %2817 = vpow2.f32 %v1322_v26  ;;  %v1184_v41 = vrot.slane %v1183_v25, 1  ;;  %v1191_v42 = vrot.slane %v1190_v27, 2  ;;  %v1198_v43 = vrot.slane %v1197_v28, 4  ;;  %v3382_v45 = vpop.f32.mrb[21].mxu1 }
 0x546   :  { %v3384_v46 = vpop.eup %2809  ;;  %v1375_v38 = vrot.slane %v1374_v29, 4  ;;  %v1381_v11 = vsel %vm1131_vm5, %v3377_v40, 0.0  ;;  %v1324_v12 = vmul.f32 1.442695, %v1284_v33  ;;  %v1326_v30 = vmul.f32 1.442695, %v1285_v35 }
 0x547   :  { %v1382_v34 = vsel %vm1131_vm5, %v3384_v46, 0.0  ;;  %v1185_v48 = vmax.f32 %v1183_v25, %v1184_v41  ;;  %v1192_v37 = vmax.f32 %v1190_v27, %v1191_v42  ;;  %v1199_v49 = vmax.f32 %v1197_v28, %v1198_v43 }
 0x548   :  { %v1376_v50 = vadd.f32 %v1375_v38, %v1374_v29  ;;  %v1383_v52 = vadd.f32 %v1382_v34, %v1381_v11  ;;  %2819 = vpow2.f32 %v1324_v12  ;;  %v3390_v53 = vadd.f32 %v2628_v15, %v730_v44  ;;  %v3392_v55 = vpop.f32.mrb[22].mxu1 }
 0x549   :  { %v3394_v56 = vpop.eup %2811  ;;  %2821 = vpow2.f32 %v1326_v30  ;;  %v1286_v58 = vsub.f32 %v3323_v32, %v1185_v48  ;;  %v1287_v60 = vsub.f32 %v3321_v31, %v1185_v48  ;;  %v1193_v61 = vrot.slane %v1192_v37, 1  ;;  %v3398_v62 = vpop.f32.mrb[23].mxu1  ;;  %v731_v48 = vld [vmem:[%s3908_s2 + $0x90] sm:$0xff] }
 0x54a   :  { %v3400_v63 = vpop.eup %2813  ;;  %v1377_v0 = vrot.slane %v1376_v50, 2  ;;  %v1384_v47 = vrot.slane %v1383_v52, 4  ;;  %v1390_v36 = vsel %vm1131_vm5, %v3394_v56, 0.0  ;;  %v1200_v1 = vrot.slane %v1199_v49, 2 }
 0x54b   :  { %v1391_v2 = vsel %vm1131_vm5, %v3400_v63, 0.0  ;;  %v1328_v3 = vmul.f32 1.442695, %v1286_v58  ;;  %v1330_v4 = vmul.f32 1.442695, %v1287_v60  ;;  %v1194_v5 = vmax.f32 %v1192_v37, %v1193_v61  ;;  %v736_v58 = vld [vmem:[%s3908_s2 + $0xb8] sm:$0xff] }
 0x54c   :  { %v3406_v32 = vadd.f32 %v1377_v0, %v1376_v50  ;;  %v1385_v31 = vadd.f32 %v1384_v47, %v1383_v52  ;;  %v1392_v10 = vadd.f32 %v1391_v2, %v1390_v36  ;;  %v1201_v13 = vmax.f32 %v1199_v49, %v1200_v1  ;;  %v2637_v15 = vpop.f32.mrb[24].mxu1 }
 0x54d   :  { %2823 = vpow2.f32 %v1328_v3  ;;  %v1288_v17 = vsub.f32 %v3341_v54, %v1194_v5  ;;  %v1289_v18 = vsub.f32 %v3337_v51, %v1194_v5  ;;  %v1205_v19 = vsel %vm1131_vm5, %v3390_v53, -inf  ;;  %v3415_v20 = vpop.f32.mrb[25].mxu1 }
 0x54e   :  { %v3417_v59 = vpop.eup %2815  ;;  %v1386_v57 = vrot.slane %v1385_v31, 2  ;;  %v1393_v26 = vrot.slane %v1392_v10, 4  ;;  %2825 = vpow2.f32 %v1330_v4  ;;  %v1202_v23 = vrot.slane %v1201_v13, 1 }
 0x54f   :  { %v3422_v25 = vpop.eup %2817  ;;  %v1399_v51 = vsel %vm1131_vm5, %v3417_v59, 0.0  ;;  %v1332_v54 = vmul.f32 1.442695, %v1288_v17  ;;  %v1334_v27 = vmul.f32 1.442695, %v1289_v18  ;;  %v3427_v28 = vadd.f32 %v3365_v21, %v729_v14 }
 0x550   :  { %v3429_v29 = vadd.f32 %v1386_v57, %v1385_v31  ;;  %v1394_v33 = vadd.f32 %v1393_v26, %v1392_v10  ;;  %v1400_v35 = vsel %vm1131_vm5, %v3422_v25, 0.0  ;;  %v1203_v41 = vmax.f32 %v1201_v13, %v1202_v23  ;;  %v2640_v42 = vpop.f32.mrb[26].mxu1  ;;  %v738_v23 = vld [vmem:[%s3908_s2 + $0xc8] sm:$0xff] }
 0x551   :  { %v1401_v43 = vadd.f32 %v1400_v35, %v1399_v51  ;;  %2827 = vpow2.f32 %v1332_v54  ;;  %v1204_v44 = vsel %vm1131_vm5, %v3427_v28, -inf  ;;  %v3436_v38 = vadd.f32 %v3375_v39, %v732_v24  ;;  %v3438_v11 = vpop.f32.mrb[27].mxu1 }
 0x552   :  { %v3440_v21 = vpop.eup %2819  ;;  %v1395_v12 = vrot.slane %v1394_v33, 2  ;;  %2829 = vpow2.f32 %v1334_v27  ;;  %v1290_v30 = vsub.f32 %v3355_v9, %v1203_v41  ;;  %v1291_v34 = vsub.f32 %v3353_v7, %v1203_v41  ;;  %v734_v9 = vld [vmem:[%s3908_s2 + $0xa8] sm:$0xff]  ;;  %v733_v7 = vld [vmem:[%s3908_s2 + $0xa0] sm:$0xff] }
 0x553   :  { %v3447_v37 = vpop.eup %2821  ;;  %v1402_v49 = vrot.slane %v1401_v43, 4  ;;  %v1408_v39 = vsel %vm1131_vm5, %v3440_v21, 0.0  ;;  %v1206_v50 = vmax.f32 %v1204_v44, %v1205_v19  ;;  %v1214_v52 = vsel %vm1131_vm5, %v3436_v38, -inf }
 0x554   :  { %v3462_v60 = vadd.f32 %v1395_v12, %v1394_v33  ;;  %v1409_v61 = vsel %vm1131_vm5, %v3447_v37, 0.0  ;;  %v1336_v0 = vmul.f32 1.442695, %v1290_v30  ;;  %v1338_v47 = vmul.f32 1.442695, %v1291_v34  ;;  %v3466_v36 = vpop.f32.mrb[28].mxu1 }
 0x555   :  { %v1403_v1 = vadd.f32 %v1402_v49, %v1401_v43  ;;  %v1410_v2 = vadd.f32 %v1409_v61, %v1408_v39  ;;  %v1207_v3 = vrot.slane %v1206_v50, 4  ;;  %v3469_v4 = vadd.f32 %v3382_v45, %v731_v48  ;;  %v3471_v5 = vpop.f32.mrb[29].mxu1  ;;  %v735_v45 = vld [vmem:[%s3908_s2 + $0xb0] sm:$0xff]  ;;  %v737_v61 = vld [vmem:[%s3908_s2 + $0xc0] sm:$0xff] }
 0x556   :  { %2831 = vpow2.f32 %v1336_v0  ;;  %v3474_v31 = vadd.f32 %v3392_v55, %v734_v9  ;;  %v3477_v10 = vadd.f32 %v3398_v62, %v733_v7  ;;  %v3479_v13 = vadd.f32 %v2637_v15, %v736_v58 }
 0x557   :  { %v3481_v14 = vpop.eup %2823  ;;  %v1404_v17 = vrot.slane %v1403_v1, 2  ;;  %v1411_v18 = vrot.slane %v1410_v2, 4  ;;  %2833 = vpow2.f32 %v1338_v47  ;;  %v1208_v19 = vmax.f32 %v1206_v50, %v1207_v3 }
 0x558   :  { %v3486_v57 = vpop.eup %2825  ;;  %v1417_v55 = vsel %vm1131_vm5, %v3481_v14, 0.0  ;;  %v1213_v62 = vsel %vm1131_vm5, %v3469_v4, -inf  ;;  %v1223_v15 = vsel %vm1131_vm5, %v3474_v31, -inf  ;;  %v1222_v26 = vsel %vm1131_vm5, %v3477_v10, -inf  ;;  %v3499_v24 = vpop.f32.mrb[30].mxu1 }
 0x559   :  { %v3501_v51 = vadd.f32 %v1404_v17, %v1403_v1  ;;  %v1412_v54 = vadd.f32 %v1411_v18, %v1410_v2  ;;  %v1418_v27 = vsel %vm1131_vm5, %v3486_v57, 0.0  ;;  %v1209_v33 = vrot.slane %v1208_v19, 2  ;;  %v3505_v35 = vpop.f32.mrb[31].mxu1 }
 0x55a   :  { %v1419_v41 = vadd.f32 %v1418_v27, %v1417_v55  ;;  %v1215_v43 = vmax.f32 %v1213_v62, %v1214_v52  ;;  %v1224_v44 = vmax.f32 %v1222_v26, %v1223_v15  ;;  %v1232_v12 = vsel %vm1131_vm5, %v3479_v13, -inf }
 0x55b   :  { %v3509_v30 = vpop.eup %2827  ;;  %v1413_v34 = vrot.slane %v1412_v54, 2  ;;  %v1210_v48 = vmax.f32 %v1208_v19, %v1209_v33  ;;  %v3512_v49 = vadd.f32 %v3415_v20, %v735_v45  ;;  %v3514_v39 = vadd.f32 %v2640_v42, %v738_v23 }
 0x55c   :  { %v3516_v50 = vpop.eup %2829  ;;  %v1420_v9 = vrot.slane %v1419_v41, 4  ;;  %v1426_v7 = vsel %vm1131_vm5, %v3509_v30, 0.0  ;;  %v1216_v52 = vrot.slane %v1215_v43, 4  ;;  %v1225_v58 = vrot.slane %v1224_v44, 4  ;;  %v3523_v0 = vpop.f32.mrb[32].mxu1 }
 0x55d   :  { %v3525_v47 = vadd.f32 %v1413_v34, %v1412_v54  ;;  %v1427_v20 = vsel %vm1131_vm5, %v3516_v50, 0.0  ;;  %v1211_v42 = vrot.slane %v1210_v48, 1  ;;  %v1231_v1 = vsel %vm1131_vm5, %v3512_v49, -inf  ;;  %v3531_v2 = vpop.f32.mrb[33].mxu1 }
 0x55e   :  { %v1421_v3 = vadd.f32 %v1420_v9, %v1419_v41  ;;  %v1428_v17 = vadd.f32 %v1427_v20, %v1426_v7  ;;  %v1217_v18 = vmax.f32 %v1215_v43, %v1216_v52  ;;  %v1226_v19 = vmax.f32 %v1224_v44, %v1225_v58 }
 0x55f   :  { %v1212_v45 = vmax.f32 %v1210_v48, %v1211_v42  ;;  %v1233_v55 = vmax.f32 %v1231_v1, %v1232_v12  ;;  %v1241_v62 = vsel %vm1131_vm5, %v3514_v39, -inf  ;;  %v3536_v15 = vadd.f32 %v3438_v11, %v737_v61 }
 0x560   :  { %v3538_v26 = vpop.eup %2831  ;;  %v1422_v23 = vrot.slane %v1421_v3, 2  ;;  %v1429_v54 = vrot.slane %v1428_v17, 4  ;;  %v1218_v27 = vrot.slane %v1217_v18, 2  ;;  %v1227_v33 = vrot.slane %v1226_v19, 2 }
 0x561   :  { %v3540_v34 = vpop.eup %2833  ;;  %v1435_v41 = vsel %vm1131_vm5, %v3538_v26, 0.0  ;;  %v1292_v43 = vsub.f32 %v3427_v28, %v1212_v45  ;;  %v1293_v44 = vsub.f32 %v3390_v53, %v1212_v45  ;;  %v1234_v12 = vrot.slane %v1233_v55, 4  ;;  %v740_v53 = vld [vmem:[%s3908_s2 + $0xd8] sm:$0xff] }
 0x562   :  { %v3546_v48 = vadd.f32 %v1422_v23, %v1421_v3  ;;  %v1430_v11 = vadd.f32 %v1429_v54, %v1428_v17  ;;  %v1436_v9 = vsel %vm1131_vm5, %v3540_v34, 0.0  ;;  %v1219_v7 = vmax.f32 %v1217_v18, %v1218_v27  ;;  %v739_v18 = vld [vmem:[%s3908_s2 + $0xd0] sm:$0xff] }
 0x563   :  { %v1437_v52 = vadd.f32 %v1436_v9, %v1435_v41  ;;  %v1340_v58 = vmul.f32 1.442695, %v1292_v43  ;;  %v1342_v61 = vmul.f32 1.442695, %v1293_v44  ;;  %v1228_v20 = vmax.f32 %v1226_v19, %v1227_v33 }
 0x564   :  { %v1431_v42 = vrot.slane %v1430_v11, 2  ;;  %v1220_v1 = vrot.slane %v1219_v7, 1  ;;  %v1235_v8 = vmax.f32 %v1233_v55, %v1234_v12  ;;  %v1240_v28 = vsel %vm1131_vm5, %v3536_v15, -inf }
 0x565   :  { %v1438_v3 = vrot.slane %v1437_v52, 4  ;;  %2835 = vpow2.f32 %v1340_v58  ;;  %v1229_v17 = vrot.slane %v1228_v20, 1  ;;  %v1242_v45 = vmax.f32 %v1240_v28, %v1241_v62 }
 0x566   :  { %v3558_v23 = vadd.f32 %v1431_v42, %v1430_v11  ;;  %2837 = vpow2.f32 %v1342_v61  ;;  %v1221_v19 = vmax.f32 %v1219_v7, %v1220_v1  ;;  %v1236_v55 = vrot.slane %v1235_v8, 2 }
 0x567   :  { %v1439_v54 = vadd.f32 %v1438_v3, %v1437_v52  ;;  %v1230_v27 = vmax.f32 %v1228_v20, %v1229_v17  ;;  %v1243_v33 = vrot.slane %v1242_v45, 4  ;;  %v3561_v41 = vadd.f32 %v3466_v36, %v740_v53  ;;  %v742_v52 = vld [vmem:[%s3908_s2 + $0xe8] sm:$0xff]  ;;  %v741_v36 = vld [vmem:[%s3908_s2 + $0xe0] sm:$0xff] }
 0x568   :  { %v1294_v43 = vsub.f32 %v3469_v4, %v1221_v19  ;;  %v1295_v44 = vsub.f32 %v3436_v38, %v1221_v19  ;;  %v1237_v62 = vmax.f32 %v1235_v8, %v1236_v55  ;;  %v3566_v12 = vadd.f32 %v3471_v5, %v739_v18  ;;  %v744_v55 = vld [vmem:[%s3908_s2 + $0xf8] sm:$0xff] }
 0x569   :  { %v1440_v9 = vrot.slane %v1439_v54, 2  ;;  %v1296_v11 = vsub.f32 %v3477_v10, %v1230_v27  ;;  %v1297_v7 = vsub.f32 %v3474_v31, %v1230_v27  ;;  %v1244_v58 = vmax.f32 %v1242_v45, %v1243_v33 }
 0x56a   :  { %v1344_v4 = vmul.f32 1.442695, %v1294_v43  ;;  %v1346_v38 = vmul.f32 1.442695, %v1295_v44  ;;  %v1238_v8 = vrot.slane %v1237_v62, 1  ;;  %v1250_v5 = vsel %vm1131_vm5, %v3561_v41, -inf }
 0x56b   :  { %v3578_v61 = vadd.f32 %v1440_v9, %v1439_v54  ;;  %v1348_v10 = vmul.f32 1.442695, %v1296_v11  ;;  %v1350_v20 = vmul.f32 1.442695, %v1297_v7  ;;  %v1245_v31 = vrot.slane %v1244_v58, 2 }
 0x56c   :  { %2839 = vpow2.f32 %v1344_v4  ;;  %v1239_v42 = vmax.f32 %v1237_v62, %v1238_v8  ;;  %v1249_v1 = vsel %vm1131_vm5, %v3566_v12, -inf  ;;  %v3583_v28 = vadd.f32 %v3499_v24, %v742_v52 }
 0x56d   :  { %2841 = vpow2.f32 %v1346_v38  ;;  %v1246_v53 = vmax.f32 %v1244_v58, %v1245_v31  ;;  %v1251_v3 = vmax.f32 %v1249_v1, %v1250_v5  ;;  %v3586_v17 = vadd.f32 %v3505_v35, %v741_v36 }
 0x56e   :  { %2843 = vpow2.f32 %v1348_v10  ;;  %v1298_v45 = vsub.f32 %v3512_v49, %v1239_v42  ;;  %v1299_v18 = vsub.f32 %v3479_v13, %v1239_v42  ;;  %v1259_v19 = vsel %vm1131_vm5, %v3583_v28, -inf  ;;  %v743_v49 = vld [vmem:[%s3908_s2 + $0xf0] sm:$0xff] }
 0x56f   :  { %v3595_v24 = vpop.eup %2835  ;;  %2845 = vpow2.f32 %v1350_v20  ;;  %v1247_v54 = vrot.slane %v1246_v53, 1  ;;  %v1252_v27 = vrot.slane %v1251_v3, 4  ;;  %v1258_v35 = vsel %vm1131_vm5, %v3586_v17, -inf }
 0x570   :  { %v3602_v13 = vpop.eup %2837  ;;  %v1444_v33 = vsel %vm1131_vm5, %v3595_v24, 0.0  ;;  %v1352_v43 = vmul.f32 1.442695, %v1298_v45  ;;  %v1354_v44 = vmul.f32 1.442695, %v1299_v18  ;;  %v1260_v62 = vmax.f32 %v1258_v35, %v1259_v19 }
 0x571   :  { %v1445_v9 = vsel %vm1131_vm5, %v3602_v13, 0.0  ;;  %v1248_v11 = vmax.f32 %v1246_v53, %v1247_v54  ;;  %v1253_v7 = vmax.f32 %v1251_v3, %v1252_v27  ;;  %v3609_v58 = vadd.f32 %v3523_v0, %v744_v55 }
 0x572   :  { %v1446_v52 = vadd.f32 %v1445_v9, %v1444_v33  ;;  %2847 = vpow2.f32 %v1352_v43  ;;  %v1261_v36 = vrot.slane %v1260_v62, 4  ;;  %v3612_v4 = vadd.f32 %v3531_v2, %v743_v49 }
 0x573   :  { %2849 = vpow2.f32 %v1354_v44  ;;  %v1300_v38 = vsub.f32 %v3536_v15, %v1248_v11  ;;  %v1301_v8 = vsub.f32 %v3514_v39, %v1248_v11  ;;  %v1254_v5 = vrot.slane %v1253_v7, 2 }
 0x574   :  { %v1447_v10 = vrot.slane %v1446_v52, 4  ;;  %v1262_v20 = vmax.f32 %v1260_v62, %v1261_v36  ;;  %v1268_v31 = vsel %vm1131_vm5, %v3609_v58, -inf  ;;  %v1267_v0 = vsel %vm1131_vm5, %v3612_v4, -inf }
 0x575   :  { %v1356_v42 = vmul.f32 1.442695, %v1300_v38  ;;  %v1358_v1 = vmul.f32 1.442695, %v1301_v8  ;;  %v1255_v53 = vmax.f32 %v1253_v7, %v1254_v5  ;;  %v1269_v3 = vmax.f32 %v1267_v0, %v1268_v31 }
 0x576   :  { %v3620_v2 = vpop.eup %2839  ;;  %v1448_v45 = vadd.f32 %v1447_v10, %v1446_v52  ;;  %v1263_v18 = vrot.slane %v1262_v20, 2  ;;  %v1379_v15 = vrot.slane %v3406_v32, 1  ;;  %v1388_v39 = vrot.slane %v3429_v29, 1 }
 0x577   :  { %v3624_v19 = vpop.eup %2841  ;;  %v1453_v55 = vsel %vm1131_vm5, %v3620_v2, 0.0  ;;  %2851 = vpow2.f32 %v1356_v42  ;;  %v1256_v54 = vrot.slane %v1255_v53, 1  ;;  %v1270_v27 = vrot.slane %v1269_v3, 4 }
 0x578   :  { %v3628_v35 = vpop.eup %2843  ;;  %v1449_v49 = vrot.slane %v1448_v45, 2  ;;  %v1454_v33 = vsel %vm1131_vm5, %v3624_v19, 0.0  ;;  %2853 = vpow2.f32 %v1358_v1  ;;  %v1264_v43 = vmax.f32 %v1262_v20, %v1263_v18 }
 0x579   :  { %v3632_v44 = vpop.eup %2845  ;;  %v1455_v62 = vadd.f32 %v1454_v33, %v1453_v55  ;;  %v1462_v9 = vsel %vm1131_vm5, %v3628_v35, 0.0  ;;  %v1257_v11 = vmax.f32 %v1255_v53, %v1256_v54  ;;  %v1271_v7 = vmax.f32 %v1269_v3, %v1270_v27 }
 0x57a   :  { %v3636_v52 = vadd.f32 %v1449_v49, %v1448_v45  ;;  %v1463_v36 = vsel %vm1131_vm5, %v3632_v44, 0.0  ;;  %v1265_v38 = vrot.slane %v1264_v43, 1  ;;  %v1380_v8 = vadd.f32 %v1379_v15, %v3406_v32 }
 0x57b   :  { %v1456_v5 = vrot.slane %v1455_v62, 4  ;;  %v1464_v10 = vadd.f32 %v1463_v36, %v1462_v9  ;;  %v1302_v20 = vsub.f32 %v3566_v12, %v1257_v11  ;;  %v1303_v31 = vsub.f32 %v3561_v41, %v1257_v11 }
 0x57c   :  { %v3643_v0 = vpop.eup %2847  ;;  %v1266_v42 = vmax.f32 %v1264_v43, %v1265_v38  ;;  %v1272_v1 = vrot.slane %v1271_v7, 2  ;;  %2855 = vrcp.f32 %v1380_v8  ;;  %v1389_v53 = vadd.f32 %v1388_v39, %v3429_v29 }
 0x57d   :  { %v3646_v3 = vpop.eup %2849  ;;  %v1457_v45 = vadd.f32 %v1456_v5, %v1455_v62  ;;  %v1465_v18 = vrot.slane %v1464_v10, 4  ;;  %v1471_v32 = vsel %vm1131_vm5, %v3643_v0, 0.0  ;;  %v1360_v15 = vmul.f32 1.442695, %v1302_v20 }
 0x57e   :  { %v1472_v12 = vsel %vm1131_vm5, %v3646_v3, 0.0  ;;  %v1362_v55 = vmul.f32 1.442695, %v1303_v31  ;;  %v1304_v41 = vsub.f32 %v3586_v17, %v1266_v42  ;;  %v1305_v54 = vsub.f32 %v3583_v28, %v1266_v42 }
 0x57f   :  { %v1458_v27 = vrot.slane %v1457_v45, 2  ;;  %v1466_v49 = vadd.f32 %v1465_v18, %v1464_v10  ;;  %v1473_v33 = vadd.f32 %v1472_v12, %v1471_v32  ;;  %2857 = vpow2.f32 %v1360_v15 }
 0x580   :  { %2859 = vpow2.f32 %v1362_v55  ;;  %v1364_v29 = vmul.f32 1.442695, %v1304_v41  ;;  %v1366_v39 = vmul.f32 1.442695, %v1305_v54  ;;  %v1273_v43 = vmax.f32 %v1271_v7, %v1272_v1 }
 0x581   :  { %v3654_v62 = vpop.eup %2851  ;;  %v1459_v9 = vadd.f32 %v1458_v27, %v1457_v45  ;;  %v1467_v11 = vrot.slane %v1466_v49, 2  ;;  %v1474_v36 = vrot.slane %v1473_v33, 4  ;;  %2861 = vrcp.f32 %v1389_v53 }
 0x582   :  { %v3656_v38 = vpop.eup %2853  ;;  %v1480_v17 = vsel %vm1131_vm5, %v3654_v62, 0.0  ;;  %2863 = vpow2.f32 %v1364_v29  ;;  %v1274_v28 = vrot.slane %v1273_v43, 1  ;;  %v1397_v8 = vrot.slane %v3462_v60, 1 }
 0x583   :  { %v3661_v5 = vadd.f32 %v1467_v11, %v1466_v49  ;;  %v1475_v10 = vadd.f32 %v1474_v36, %v1473_v33  ;;  %v1481_v7 = vsel %vm1131_vm5, %v3656_v38, 0.0  ;;  %2865 = vpow2.f32 %v1366_v39 }
 0x584   :  { %v1482_v20 = vadd.f32 %v1481_v7, %v1480_v17  ;;  %v1275_v31 = vmax.f32 %v1273_v43, %v1274_v28  ;;  %v1398_v42 = vadd.f32 %v1397_v8, %v3462_v60  ;;  %v1406_v1 = vrot.slane %v3501_v51, 1 }
 0x585   :  { %v1476_v53 = vrot.slane %v1475_v10, 2  ;;  %v1415_v45 = vrot.slane %v3525_v47, 1  ;;  %v1424_v18 = vrot.slane %v3546_v48, 1  ;;  %v1433_v32 = vrot.slane %v3558_v23, 1 }
 0x586   :  { %v2856_v15 = vpop.eup %2855  ;;  %v1483_v12 = vrot.slane %v1482_v20, 4  ;;  %v1306_v55 = vsub.f32 %v3612_v4, %v1275_v31  ;;  %v1307_v41 = vsub.f32 %v3609_v58, %v1275_v31  ;;  %2867 = vrcp.f32 %v1398_v42 }
 0x587   :  { %v1477_v54 = vadd.f32 %v1476_v53, %v1475_v10  ;;  %v1532_v27 = vmul.f32 %v2856_v15, %v3359_v16  ;;  %v1533_v60 = vmul.f32 %v2856_v15, %v3367_v22  ;;  %v1407_v49 = vadd.f32 %v1406_v1, %v3501_v51 }
 0x588   :  { %v1484_v33 = vadd.f32 %v1483_v12, %v1482_v20  ;;  %v1368_v29 = vmul.f32 1.442695, %v1306_v55  ;;  %v1370_v39 = vmul.f32 1.442695, %v1307_v41  ;;  %v1416_v43 = vadd.f32 %v1415_v45, %v3525_v47 }
 0x589   :  { %v3676_v11 = vpop.eup %2857  ;;  %2654 = vmatprep.mubr.msk.f32.mxu0 %vm1131_vm5, %v1532_v27  ;;  %2869 = vrcp.f32 %v1407_v49  ;;  %v1425_v58 = vadd.f32 %v1424_v18, %v3546_v48  ;;  %v1434_v4 = vadd.f32 %v1433_v32, %v3558_v23  ;;  %v1442_v16 = vrot.slane %v3578_v61, 1 }
 0x58a   :  { %v3682_v36 = vpop.eup %2859  ;;  %v1485_v22 = vrot.slane %v1484_v33, 2  ;;  %v1489_v51 = vsel %vm1131_vm5, %v3676_v11, 0.0  ;;  %2871 = vpow2.f32 %v1368_v29  ;;  %2655 = vmatmul.mubr.msk.f32.vlgmr.msra.gmra.mrb[4].mxu0 %vm1131_vm5, %v1533_v60  ;;  %v1451_v47 = vrot.slane %v3636_v52, 1 }
 0x58b   :  { %v2862_v17 = vpop.eup %2861  ;;  %v1490_v28 = vsel %vm1131_vm5, %v3682_v36, 0.0  ;;  %2873 = vpow2.f32 %v1370_v39  ;;  %v1443_v48 = vadd.f32 %v1442_v16, %v3578_v61  ;;  %v1460_v23 = vrot.slane %v1459_v9, 1 }
 0x58c   :  { %v3691_v8 = vpop.eup %2863  ;;  %v1486_v10 = vadd.f32 %v1485_v22, %v1484_v33  ;;  %v1491_v7 = vadd.f32 %v1490_v28, %v1489_v51  ;;  %v1534_v20 = vmul.f32 %v2862_v17, %v3377_v40  ;;  %v1535_v31 = vmul.f32 %v2862_v17, %v3384_v46 }
 0x58d   :  { %v3695_v42 = vpop.eup %2865  ;;  %v1498_v1 = vsel %vm1131_vm5, %v3691_v8, 0.0  ;;  %2875 = vrcp.f32 %v1416_v43  ;;  %v1452_v53 = vadd.f32 %v1451_v47, %v3636_v52  ;;  %v1461_v45 = vadd.f32 %v1460_v23, %v1459_v9 }
 0x58e   :  { %v1492_v18 = vrot.slane %v1491_v7, 4  ;;  %v1499_v61 = vsel %vm1131_vm5, %v3695_v42, 0.0  ;;  %2657 = vmatprep.mubr.msk.f32.mxu0 %vm1131_vm5, %v1534_v20  ;;  %2877 = vrcp.f32 %v1425_v58  ;;  %v1469_v40 = vrot.slane %v3661_v5, 1 }
 0x58f   :  { %v1500_v32 = vadd.f32 %v1499_v61, %v1498_v1  ;;  %2658 = vmatmul.mubr.msk.f32.gmra.mrb[6].mxu0 %vm1131_vm5, %v1535_v31  ;;  %2879 = vrcp.f32 %v1434_v4  ;;  %v1478_v46 = vrot.slane %v1477_v54, 1  ;;  %v1487_v15 = vrot.slane %v1486_v10, 1 }
 0x590   :  { %v2868_v12 = vpop.eup %2867  ;;  %v1493_v55 = vadd.f32 %v1492_v18, %v1491_v7  ;;  %2881 = vrcp.f32 %v1443_v48  ;;  %v1470_v52 = vadd.f32 %v1469_v40, %v3661_v5 }
 0x591   :  { %v1501_v9 = vrot.slane %v1500_v32, 4  ;;  %v1536_v41 = vmul.f32 %v2868_v12, %v3394_v56  ;;  %v1537_v27 = vmul.f32 %v2868_v12, %v3400_v63  ;;  %2883 = vrcp.f32 %v1452_v53 }
 0x592   :  { %v1494_v60 = vrot.slane %v1493_v55, 2  ;;  %2885 = vrcp.f32 %v1461_v45  ;;  %v1479_v49 = vadd.f32 %v1478_v46, %v1477_v54  ;;  %v1488_v33 = vadd.f32 %v1487_v15, %v1486_v10 }
 0x593   :  { %v2870_v29 = vpop.eup %2869  ;;  %v1502_v39 = vadd.f32 %v1501_v9, %v1500_v32  ;;  %2660 = vmatprep.mubr.msk.f32.mxu0 %vm1131_vm5, %v1536_v41  ;;  %2887 = vrcp.f32 %v1470_v52 }
 0x594   :  { %v3709_v43 = vpop.eup %2871  ;;  %v1495_v58 = vadd.f32 %v1494_v60, %v1493_v55  ;;  %2661 = vmatmul.mubr.msk.f32.gmra.mrb[8].mxu0 %vm1131_vm5, %v1537_v27  ;;  %v1538_v5 = vmul.f32 %v2870_v29, %v3417_v59  ;;  %v1539_v56 = vmul.f32 %v2870_v29, %v3422_v25  ;;  %2889 = vrcp.f32 %v1479_v49  ;;  %v3929_v49 = vld [vmem:[#allocation5_spill] sm:$0xff] }
 0x595   :  { %v3714_v63 = vpop.eup %2873  ;;  %v1503_v4 = vrot.slane %v1502_v39, 2  ;;  %v1507_v54 = vsel %vm1131_vm5, %v3709_v43, 0.0  ;;  %2891 = vrcp.f32 %v1488_v33 }
 0x596   :  { %v1508_v16 = vsel %vm1131_vm5, %v3714_v63, 0.0  ;;  %2663 = vmatprep.mubr.msk.f32.mxu0 %vm1131_vm5, %v1538_v5  ;;  %v1496_v22 = vrot.slane %v1495_v58, 1 }
 0x597   :  { %v2876_v51 = vpop.eup %2875  ;;  %v1504_v47 = vadd.f32 %v1503_v4, %v1502_v39  ;;  %v1509_v17 = vadd.f32 %v1508_v16, %v1507_v54 }
 0x598   :  { %v2878_v59 = vpop.eup %2877  ;;  %2664 = vmatmul.mubr.msk.f32.gmra.mrb[10].mxu0 %vm1131_vm5, %v1539_v56  ;;  %v1540_v25 = vmul.f32 %v2876_v51, %v3440_v21  ;;  %v1541_v28 = vmul.f32 %v2876_v51, %v3447_v37  ;;  %v1497_v48 = vadd.f32 %v1496_v22, %v1495_v58 }
 0x599   :  { %v2880_v23 = vpop.eup %2879  ;;  %v1510_v10 = vrot.slane %v1509_v17, 4  ;;  %v1542_v7 = vmul.f32 %v2878_v59, %v3481_v14  ;;  %v1543_v20 = vmul.f32 %v2878_v59, %v3486_v57  ;;  %v1505_v31 = vrot.slane %v1504_v47, 1 }
 0x59a   :  { %v2882_v1 = vpop.eup %2881  ;;  %2666 = vmatprep.mubr.msk.f32.mxu0 %vm1131_vm5, %v1540_v25  ;;  %v1544_v53 = vmul.f32 %v2880_v23, %v3509_v30  ;;  %v1545_v45 = vmul.f32 %v2880_v23, %v3516_v50  ;;  %2893 = vrcp.f32 %v1497_v48 }
 0x59b   :  { %v2884_v18 = vpop.eup %2883  ;;  %v1511_v21 = vadd.f32 %v1510_v10, %v1509_v17  ;;  %v1546_v37 = vmul.f32 %v2882_v1, %v3538_v26  ;;  %v1547_v61 = vmul.f32 %v2882_v1, %v3540_v34  ;;  %v1506_v40 = vadd.f32 %v1505_v31, %v1504_v47 }
 0x59c   :  { %v2886_v32 = vpop.eup %2885  ;;  %2667 = vmatmul.mubr.msk.f32.gmra.mrb[12].mxu0 %vm1131_vm5, %v1541_v28  ;;  %v1548_v14 = vmul.f32 %v2884_v18, %v3595_v24  ;;  %v1549_v57 = vmul.f32 %v2884_v18, %v3602_v13 }
 0x59d   :  { %v2888_v46 = vpop.eup %2887  ;;  %v1512_v15 = vrot.slane %v1511_v21, 2  ;;  %2669 = vmatprep.mubr.msk.f32.mxu0 %vm1131_vm5, %v1542_v7  ;;  %v1550_v30 = vmul.f32 %v2886_v32, %v3620_v2  ;;  %v1551_v50 = vmul.f32 %v2886_v32, %v3624_v19  ;;  %2895 = vrcp.f32 %v1506_v40 }
 0x59e   :  { %v2890_v26 = vpop.eup %2889  ;;  %v1552_v34 = vmul.f32 %v2888_v46, %v3628_v35  ;;  %v1553_v12 = vmul.f32 %v2888_v46, %v3632_v44 }
 0x59f   :  { %v2892_v55 = vpop.eup %2891  ;;  %v1513_v52 = vadd.f32 %v1512_v15, %v1511_v21  ;;  %v1554_v24 = vmul.f32 %v2890_v26, %v3643_v0  ;;  %v1555_v13 = vmul.f32 %v2890_v26, %v3646_v3 }
 0x5a0   :  { %2670 = vmatmul.mubr.msk.f32.gmra.mrb[14].mxu0 %vm1131_vm5, %v1543_v20  ;;  %v1556_v9 = vmul.f32 %v2892_v55, %v3654_v62  ;;  %v1557_v2 = vmul.f32 %v2892_v55, %v3656_v38 }
 0x5a1   :  { %2672 = vmatprep.mubr.msk.f32.mxu0 %vm1131_vm5, %v1544_v53  ;;  %v1514_v19 = vrot.slane %v1513_v52, 1 }
 0x5a3   :  { %v1515_v41 = vadd.f32 %v1514_v19, %v1513_v52 }
 0x5a4   :  { %v2894_v27 = vpop.eup %2893  ;;  %2673 = vmatmul.mubr.msk.f32.gmra.mrb[16].mxu0 %vm1131_vm5, %v1545_v45 }
 0x5a5   :  { %2675 = vmatprep.mubr.msk.f32.mxu0 %vm1131_vm5, %v1546_v37  ;;  %v1558_v35 = vmul.f32 %v2894_v27, %v3676_v11  ;;  %v1559_v44 = vmul.f32 %v2894_v27, %v3682_v36  ;;  %2897 = vrcp.f32 %v1515_v41 }
 0x5a7   :  { %v2896_v0 = vpop.eup %2895 }
 0x5a8   :  { %2676 = vmatmul.mubr.msk.f32.gmra.mrb[18].mxu0 %vm1131_vm5, %v1547_v61  ;;  %v1560_v3 = vmul.f32 %v2896_v0, %v3691_v8  ;;  %v1561_v62 = vmul.f32 %v2896_v0, %v3695_v42 }
 0x5a9   :  { %2678 = vmatprep.mubr.msk.f32.mxu0 %vm1131_vm5, %v1548_v14 }
 0x5ac   :  { %2679 = vmatmul.mubr.msk.f32.gmra.mrb[20].mxu0 %vm1131_vm5, %v1549_v57 }
 0x5ad   :  { %2681 = vmatprep.mubr.msk.f32.mxu0 %vm1131_vm5, %v1550_v30 }
 0x5af   :  { %v2898_v38 = vpop.eup %2897 }
 0x5b0   :  { %2682 = vmatmul.mubr.msk.f32.gmra.mrb[22].mxu0 %vm1131_vm5, %v1551_v50  ;;  %v1562_v11 = vmul.f32 %v2898_v38, %v3709_v43  ;;  %v1563_v36 = vmul.f32 %v2898_v38, %v3714_v63 }
 0x5b1   :  { %2684 = vmatprep.mubr.msk.f32.mxu0 %vm1131_vm5, %v1552_v34 }
 0x5b4   :  { %2685 = vmatmul.mubr.msk.f32.gmra.mrb[24].mxu0 %vm1131_vm5, %v1553_v12 }
 0x5b5   :  { %2687 = vmatprep.mubr.msk.f32.mxu0 %vm1131_vm5, %v1554_v24 }
 0x5b8   :  { %2688 = vmatmul.mubr.msk.f32.gmra.mrb[26].mxu0 %vm1131_vm5, %v1555_v13 }
 0x5b9   :  { %2690 = vmatprep.mubr.msk.f32.mxu0 %vm1131_vm5, %v1556_v9 }
 0x5bc   :  { %2691 = vmatmul.mubr.msk.f32.gmra.mrb[28].mxu0 %vm1131_vm5, %v1557_v2 }
 0x5bd   :  { %2693 = vmatprep.mubr.msk.f32.mxu0 %vm1131_vm5, %v1558_v35 }
 0x5c0   :  { %2694 = vmatmul.mubr.msk.f32.gmra.mrb[30].mxu0 %vm1131_vm5, %v1559_v44 }
 0x5c1   :  { %2696 = vmatprep.mubr.msk.f32.mxu0 %vm1131_vm5, %v1560_v3 }
 0x5c4   :  { %2697 = vmatmul.mubr.msk.f32.gmra.mrb[32].mxu0 %vm1131_vm5, %v1561_v62 }
 0x5c5   :  { %2699 = vmatprep.mubr.msk.f32.mxu0 %vm1131_vm5, %v1562_v11 }
 0x5c8   :  { %2700 = vmatmul.mubr.msk.f32.gmra.mrb[34].mxu0 %vm1131_vm5, %v1563_v36 }
 0x65d   :  { %v2656_v8 = vpop.f32.mrb[4].mxu0 }
 0x65e   :  { %v1888_v42 = vmul.f32 %v2656_v8, %v3075_v6  ;;  %v1728_v60 = vpop.f32.mrb[5].mxu0 }
 0x65f   :  { %v1887_v33 = vmul.f32 %v1728_v60, %v3929_v49 }
 0x660   :  { %v1920_v29 = vsel %vm841_vm4, %v1888_v42, 0.0 }
 0x661   :  { %v1919_v39 = vsel %vm841_vm4, %v1887_v33, 0.0 }
 0x662   :  { %v1921_v43 = vadd.f32 %v1920_v29, %v1919_v39  ;;  %v2659_v58 = vpop.f32.mrb[6].mxu0 }
 0x663   :  { %v1890_v5 = vmul.f32 %v2659_v58, %v3075_v6  ;;  %v1738_v56 = vpop.f32.mrb[7].mxu0 }
 0x664   :  { %v1922_v63 = vrot.slane %v1921_v43, 4  ;;  %v1889_v4 = vmul.f32 %v1738_v56, %v3929_v49 }
 0x665   :  { %v1929_v54 = vsel %vm841_vm4, %v1890_v5, 0.0 }
 0x666   :  { %v1923_v16 = vadd.f32 %v1922_v63, %v1921_v43  ;;  %v1928_v22 = vsel %vm841_vm4, %v1889_v4, 0.0 }
 0x667   :  { %v1930_v51 = vadd.f32 %v1929_v54, %v1928_v22  ;;  %v2662_v47 = vpop.f32.mrb[8].mxu0 }
 0x668   :  { %v1924_v17 = vrot.slane %v1923_v16, 2  ;;  %v1892_v59 = vmul.f32 %v2662_v47, %v3075_v6  ;;  %v1748_v25 = vpop.f32.mrb[9].mxu0 }
 0x669   :  { %v1931_v28 = vrot.slane %v1930_v51, 4  ;;  %v1891_v48 = vmul.f32 %v1748_v25, %v3929_v49 }
 0x66a   :  { %v1938_v23 = vsel %vm841_vm4, %v1892_v59, 0.0  ;;  %v1925_v10 = vadd.f32 %v1924_v17, %v1923_v16 }
 0x66b   :  { %v1932_v7 = vadd.f32 %v1931_v28, %v1930_v51  ;;  %v1937_v20 = vsel %vm841_vm4, %v1891_v48, 0.0  ;;  %v2665_v31 = vpop.f32.mrb[10].mxu0 }
 0x66c   :  { %v1939_v1 = vadd.f32 %v1938_v23, %v1937_v20  ;;  %v1894_v53 = vmul.f32 %v2665_v31, %v3075_v6  ;;  %v1758_v45 = vpop.f32.mrb[11].mxu0  ;;  %v1926_v40 = vrot.slane %v1925_v10, 1 }
 0x66d   :  { %v1933_v18 = vrot.slane %v1932_v7, 2  ;;  %v1893_v21 = vmul.f32 %v1758_v45, %v3929_v49 }
 0x66e   :  { %v1940_v37 = vrot.slane %v1939_v1, 4  ;;  %v1947_v61 = vsel %vm841_vm4, %v1894_v53, 0.0  ;;  %v1927_v24 = vadd.f32 %v1926_v40, %v1925_v10 }
 0x66f   :  { %v1934_v32 = vadd.f32 %v1933_v18, %v1932_v7  ;;  %v1946_v14 = vsel %vm841_vm4, %v1893_v21, 0.0  ;;  %v2668_v57 = vpop.f32.mrb[12].mxu0 }
 0x670   :  { %v1941_v46 = vadd.f32 %v1940_v37, %v1939_v1  ;;  %v1948_v15 = vadd.f32 %v1947_v61, %v1946_v14  ;;  %v1896_v30 = vmul.f32 %v2668_v57, %v3075_v6  ;;  %v1768_v50 = vpop.f32.mrb[13].mxu0 }
 0x671   :  { %v1935_v26 = vrot.slane %v1934_v32, 1  ;;  %v1895_v34 = vmul.f32 %v1768_v50, %v3929_v49 }
 0x672   :  { %v1942_v12 = vrot.slane %v1941_v46, 2  ;;  %v1949_v55 = vrot.slane %v1948_v15, 4  ;;  %v1956_v52 = vsel %vm841_vm4, %v1896_v30, 0.0 }
 0x673   :  { %v1936_v13 = vadd.f32 %v1935_v26, %v1934_v32  ;;  %v1955_v9 = vsel %vm841_vm4, %v1895_v34, 0.0  ;;  %v2671_v2 = vpop.f32.mrb[14].mxu0 }
 0x674   :  { %v1943_v19 = vadd.f32 %v1942_v12, %v1941_v46  ;;  %v1950_v41 = vadd.f32 %v1949_v55, %v1948_v15  ;;  %v1957_v27 = vadd.f32 %v1956_v52, %v1955_v9  ;;  %v1898_v35 = vmul.f32 %v2671_v2, %v3075_v6  ;;  %v1778_v44 = vpop.f32.mrb[15].mxu0 }
 0x675   :  { %v2087_v0 = vsel %vm2086_vm6, %v1936_v13, %v1927_v24  ;;  %v1897_v3 = vmul.f32 %v1778_v44, %v3929_v49 }
 0x676   :  { %v1944_v62 = vrot.slane %v1943_v19, 1  ;;  %v1951_v38 = vrot.slane %v1950_v41, 2  ;;  %v1958_v11 = vrot.slane %v1957_v27, 4  ;;  %v1965_v36 = vsel %vm841_vm4, %v1898_v35, 0.0 }
 0x677   :  { %v1964_v8 = vsel %vm841_vm4, %v1897_v3, 0.0  ;;  %v2674_v42 = vpop.f32.mrb[16].mxu0 }
 0x678   :  { %v1945_v60 = vadd.f32 %v1944_v62, %v1943_v19  ;;  %v1952_v33 = vadd.f32 %v1951_v38, %v1950_v41  ;;  %v1959_v29 = vadd.f32 %v1958_v11, %v1957_v27  ;;  %v1966_v39 = vadd.f32 %v1965_v36, %v1964_v8  ;;  %v1788_v43 = vpop.f32.mrb[17].mxu0 }
 0x679   :  { %v1900_v58 = vmul.f32 %v2674_v42, %v3075_v6  ;;  %v1899_v5 = vmul.f32 %v1788_v43, %v3929_v49 }
 0x67a   :  { %v1953_v56 = vrot.slane %v1952_v33, 1  ;;  %v1960_v63 = vrot.slane %v1959_v29, 2  ;;  %v1967_v4 = vrot.slane %v1966_v39, 4  ;;  %v2089_v54 = vsel %vm2088_vm7, %v1945_v60, %v2087_v0 }
 0x67b   :  { %v1974_v16 = vsel %vm841_vm4, %v1900_v58, 0.0  ;;  %v1973_v22 = vsel %vm841_vm4, %v1899_v5, 0.0  ;;  %v2677_v51 = vpop.f32.mrb[18].mxu0 }
 0x67c   :  { %v1954_v47 = vadd.f32 %v1953_v56, %v1952_v33  ;;  %v1961_v17 = vadd.f32 %v1960_v63, %v1959_v29  ;;  %v1968_v59 = vadd.f32 %v1967_v4, %v1966_v39  ;;  %v1975_v25 = vadd.f32 %v1974_v16, %v1973_v22  ;;  %v1798_v28 = vpop.f32.mrb[19].mxu0 }
 0x67d   :  { %v1902_v48 = vmul.f32 %v2677_v51, %v3075_v6  ;;  %v1901_v23 = vmul.f32 %v1798_v28, %v3929_v49 }
 0x67e   :  { %v1962_v10 = vrot.slane %v1961_v17, 1  ;;  %v1969_v7 = vrot.slane %v1968_v59, 2  ;;  %v1976_v20 = vrot.slane %v1975_v25, 4  ;;  %v2091_v31 = vsel %vm2090_vm8, %v1954_v47, %v2089_v54 }
 0x67f   :  { %v1983_v1 = vsel %vm841_vm4, %v1902_v48, 0.0  ;;  %v1982_v53 = vsel %vm841_vm4, %v1901_v23, 0.0  ;;  %v2680_v45 = vpop.f32.mrb[20].mxu0 }
 0x680   :  { %v1963_v18 = vadd.f32 %v1962_v10, %v1961_v17  ;;  %v1970_v21 = vadd.f32 %v1969_v7, %v1968_v59  ;;  %v1977_v37 = vadd.f32 %v1976_v20, %v1975_v25  ;;  %v1984_v61 = vadd.f32 %v1983_v1, %v1982_v53  ;;  %v1808_v40 = vpop.f32.mrb[21].mxu0 }
 0x681   :  { %v1904_v32 = vmul.f32 %v2680_v45, %v3075_v6  ;;  %v1903_v14 = vmul.f32 %v1808_v40, %v3929_v49 }
 0x682   :  { %v1971_v57 = vrot.slane %v1970_v21, 1  ;;  %v1978_v46 = vrot.slane %v1977_v37, 2  ;;  %v1985_v15 = vrot.slane %v1984_v61, 4  ;;  %v2093_v30 = vsel %vm2092_vm9, %v1963_v18, %v2091_v31 }
 0x683   :  { %v1992_v50 = vsel %vm841_vm4, %v1904_v32, 0.0  ;;  %v1991_v26 = vsel %vm841_vm4, %v1903_v14, 0.0  ;;  %v2683_v34 = vpop.f32.mrb[22].mxu0 }
 0x684   :  { %v1972_v12 = vadd.f32 %v1971_v57, %v1970_v21  ;;  %v1979_v55 = vadd.f32 %v1978_v46, %v1977_v37  ;;  %v1986_v52 = vadd.f32 %v1985_v15, %v1984_v61  ;;  %v1993_v24 = vadd.f32 %v1992_v50, %v1991_v26  ;;  %v1818_v13 = vpop.f32.mrb[23].mxu0 }
 0x685   :  { %v1906_v9 = vmul.f32 %v2683_v34, %v3075_v6  ;;  %v1905_v2 = vmul.f32 %v1818_v13, %v3929_v49 }
 0x686   :  { %v1980_v19 = vrot.slane %v1979_v55, 1  ;;  %v1987_v41 = vrot.slane %v1986_v52, 2  ;;  %v1994_v27 = vrot.slane %v1993_v24, 4  ;;  %v2095_v35 = vsel %vm2094_vm10, %v1972_v12, %v2093_v30 }
 0x687   :  { %v2001_v44 = vsel %vm841_vm4, %v1906_v9, 0.0  ;;  %v2000_v0 = vsel %vm841_vm4, %v1905_v2, 0.0  ;;  %v2686_v3 = vpop.f32.mrb[24].mxu0 }
 0x688   :  { %v1988_v62 = vadd.f32 %v1987_v41, %v1986_v52  ;;  %v1995_v38 = vadd.f32 %v1994_v27, %v1993_v24  ;;  %v2002_v11 = vadd.f32 %v2001_v44, %v2000_v0  ;;  %v1908_v36 = vmul.f32 %v2686_v3, %v3075_v6  ;;  %v1828_v8 = vpop.f32.mrb[25].mxu0 }
 0x689   :  { %v1907_v42 = vmul.f32 %v1828_v8, %v3929_v49  ;;  %v1981_v60 = vadd.f32 %v1980_v19, %v1979_v55 }
 0x68a   :  { %v1996_v33 = vrot.slane %v1995_v38, 2  ;;  %v2003_v29 = vrot.slane %v2002_v11, 4  ;;  %v2010_v39 = vsel %vm841_vm4, %v1908_v36, 0.0  ;;  %v1989_v43 = vrot.slane %v1988_v62, 1 }
 0x68b   :  { %v2009_v58 = vsel %vm841_vm4, %v1907_v42, 0.0  ;;  %v2689_v5 = vpop.f32.mrb[26].mxu0  ;;  %v2097_v56 = vsel %vm2096_vm11, %v1981_v60, %v2095_v35 }
 0x68c   :  { %v1997_v63 = vadd.f32 %v1996_v33, %v1995_v38  ;;  %v2004_v4 = vadd.f32 %v2003_v29, %v2002_v11  ;;  %v2011_v54 = vadd.f32 %v2010_v39, %v2009_v58  ;;  %v1910_v16 = vmul.f32 %v2689_v5, %v3075_v6  ;;  %v1838_v22 = vpop.f32.mrb[27].mxu0 }
 0x68d   :  { %v1909_v51 = vmul.f32 %v1838_v22, %v3929_v49  ;;  %v1990_v47 = vadd.f32 %v1989_v43, %v1988_v62 }
 0x68e   :  { %v2005_v17 = vrot.slane %v2004_v4, 2  ;;  %v2012_v59 = vrot.slane %v2011_v54, 4  ;;  %v2019_v25 = vsel %vm841_vm4, %v1910_v16, 0.0  ;;  %v1998_v28 = vrot.slane %v1997_v63, 1 }
 0x68f   :  { %v2018_v48 = vsel %vm841_vm4, %v1909_v51, 0.0  ;;  %v3825_v23 = vsel %vm2098_vm12, %v1990_v47, %v2097_v56  ;;  %v2692_v10 = vpop.f32.mrb[28].mxu0 }
 0x690   :  { %v2006_v7 = vadd.f32 %v2005_v17, %v2004_v4  ;;  %v2013_v20 = vadd.f32 %v2012_v59, %v2011_v54  ;;  %v2020_v31 = vadd.f32 %v2019_v25, %v2018_v48  ;;  %2111 = vrot.lane.b32.xlu1 %v3825_v23, %s2935_s3  ;;  %v1848_v1 = vpop.f32.mrb[29].mxu0  ;;  %v1912_v53 = vmul.f32 %v2692_v10, %v3075_v6 }
 0x691   :  { %v1911_v45 = vmul.f32 %v1848_v1, %v3929_v49  ;;  %v1999_v61 = vadd.f32 %v1998_v28, %v1997_v63 }
 0x692   :  { %v2007_v18 = vrot.slane %v2006_v7, 1  ;;  %v2014_v21 = vrot.slane %v2013_v20, 2  ;;  %v2021_v37 = vrot.slane %v2020_v31, 4  ;;  %v2028_v40 = vsel %vm841_vm4, %v1912_v53, 0.0 }
 0x693   :  { %v2027_v32 = vsel %vm841_vm4, %v1911_v45, 0.0  ;;  %v2695_v14 = vpop.f32.mrb[30].mxu0 }
 0x694   :  { %v2008_v57 = vadd.f32 %v2007_v18, %v2006_v7  ;;  %v2015_v46 = vadd.f32 %v2014_v21, %v2013_v20  ;;  %v2022_v15 = vadd.f32 %v2021_v37, %v2020_v31  ;;  %v2029_v30 = vadd.f32 %v2028_v40, %v2027_v32  ;;  %v1858_v50 = vpop.f32.mrb[31].mxu0  ;;  %v2179_v32 = vld [vmem:[%s3916_s10] sm:$0xff] }
 0x695   :  { %v1914_v26 = vmul.f32 %v2695_v14, %v3075_v6  ;;  %v1913_v34 = vmul.f32 %v1858_v50, %v3929_v49  ;;  %v2180_v14 = vld [vmem:[%s3916_s10 + $0x8] sm:$0xff]  ;;  %v2448_v50 = vld [vmem:[%s3915_s9] ss:$0 sm:$0xff] }
 0x696   :  { %v2100_v12 = vsel %vm2086_vm6, %v2008_v57, %v1999_v61  ;;  %v2016_v55 = vrot.slane %v2015_v46, 1  ;;  %v2023_v52 = vrot.slane %v2022_v15, 2  ;;  %v2030_v24 = vrot.slane %v2029_v30, 4 }
 0x697   :  { %v2037_v13 = vsel %vm841_vm4, %v1914_v26, 0.0  ;;  %v2036_v9 = vsel %vm841_vm4, %v1913_v34, 0.0  ;;  %v2698_v2 = vpop.f32.mrb[32].mxu0  ;;  %v2760_v57 = vpack.c.bf16 %v2180_v14, %v2179_v32  ;;  %v2109_v34 = vadd.f32 %v2448_v50, %v3825_v23 }
 0x698   :  { %v2017_v19 = vadd.f32 %v2016_v55, %v2015_v46  ;;  %v2024_v41 = vadd.f32 %v2023_v52, %v2022_v15  ;;  %v2031_v27 = vadd.f32 %v2030_v24, %v2029_v30  ;;  %v2038_v35 = vadd.f32 %v2037_v13, %v2036_v9  ;;  %v1868_v44 = vpop.f32.mrb[33].mxu0  ;;  %v2181_v46 = vld [vmem:[%s3916_s10 + $0x10] sm:$0xff]  ;;  %v2182_v15 = vld [vmem:[%s3916_s10 + $0x18] sm:$0xff] }
 0x699   :  { %v1916_v0 = vmul.f32 %v2698_v2, %v3075_v6  ;;  %v1915_v3 = vmul.f32 %v1868_v44, %v3929_v49  ;;  %2761 = vmatprep.subr.bf16.mxu0 %v2760_v57  ;;  %v2764_v30 = vpack.c.bf16 %v2182_v15, %v2181_v46  ;;  %v2455_v46 = vld [vmem:[%s3917_s11] ss:$0 sm:$0xff] }
 0x69a   :  { %v2025_v62 = vrot.slane %v2024_v41, 1  ;;  %v2032_v38 = vrot.slane %v2031_v27, 2  ;;  %v2039_v11 = vrot.slane %v2038_v35, 4  ;;  %v2101_v36 = vsel %vm2088_vm7, %v2017_v19, %v2100_v12  ;;  %2763 = vmatpush3.bf16.msra.mxu0 %v2760_v57  ;;  %v2910_v57 = vld [vmem:[%s3907_s1 + $0x8] sm:$0xff] }
 0x69b   :  { %v2046_v8 = vsel %vm841_vm4, %v1916_v0, 0.0  ;;  %v2045_v42 = vsel %vm841_vm4, %v1915_v3, 0.0  ;;  %v2701_v60 = vpop.f32.mrb[34].mxu0  ;;  %2765 = vmatprep.subr.bf16.mxu0 %v2764_v30 }
 0x69c   :  { %v2026_v33 = vadd.f32 %v2025_v62, %v2024_v41  ;;  %v2033_v29 = vadd.f32 %v2032_v38, %v2031_v27  ;;  %v2040_v39 = vadd.f32 %v2039_v11, %v2038_v35  ;;  %v2047_v43 = vadd.f32 %v2046_v8, %v2045_v42  ;;  %v1878_v58 = vpop.f32.mrb[35].mxu0 }
 0x69d   :  { %v1918_v5 = vmul.f32 %v2701_v60, %v3075_v6  ;;  %v1917_v56 = vmul.f32 %v1878_v58, %v3929_v49 }
 0x69e   :  { %v2034_v63 = vrot.slane %v2033_v29, 1  ;;  %v2041_v4 = vrot.slane %v2040_v39, 2  ;;  %v2048_v54 = vrot.slane %v2047_v43, 4  ;;  %v2102_v16 = vsel %vm2090_vm8, %v2026_v33, %v2101_v36  ;;  %2767 = vmatpush3.bf16.msra.mxu0 %v2764_v30 }
 0x69f   :  { %v2055_v22 = vsel %vm841_vm4, %v1918_v5, 0.0  ;;  %v2054_v51 = vsel %vm841_vm4, %v1917_v56, 0.0 }
 0x6a0   :  { %v2035_v47 = vadd.f32 %v2034_v63, %v2033_v29  ;;  %v2042_v17 = vadd.f32 %v2041_v4, %v2040_v39  ;;  %v2049_v59 = vadd.f32 %v2048_v54, %v2047_v43  ;;  %v2056_v25 = vadd.f32 %v2055_v22, %v2054_v51  ;;  %v2449_v4 = vld [vmem:[%s3920_s14] ss:$0 sm:$0xff] }
 0x6a1   :  { %v2450_v22 = vld [vmem:[%s3921_s15] ss:$0 sm:$0xff] }
 0x6a2   :  { %v2043_v28 = vrot.slane %v2042_v17, 1  ;;  %v2050_v48 = vrot.slane %v2049_v59, 2  ;;  %v2057_v10 = vrot.slane %v2056_v25, 4  ;;  %v2103_v6 = vsel %vm2092_vm9, %v2035_v47, %v2102_v16 }
 0x6a4   :  { %v2044_v7 = vadd.f32 %v2043_v28, %v2042_v17  ;;  %v2051_v49 = vadd.f32 %v2050_v48, %v2049_v59  ;;  %v2058_v20 = vadd.f32 %v2057_v10, %v2056_v25 }
 0x6a6   :  { %v2052_v31 = vrot.slane %v2051_v49, 1  ;;  %v2059_v1 = vrot.slane %v2058_v20, 2  ;;  %v2104_v53 = vsel %vm2094_vm10, %v2044_v7, %v2103_v6 }
 0x6a8   :  { %v2060_v45 = vadd.f32 %v2059_v1, %v2058_v20  ;;  %v2053_v18 = vadd.f32 %v2052_v31, %v2051_v49 }
 0x6aa   :  { %v2061_v21 = vrot.slane %v2060_v45, 1  ;;  %v2105_v37 = vsel %vm2096_vm11, %v2053_v18, %v2104_v53  ;;  %v2909_v53 = vld [vmem:[%s3907_s1] sm:$0xff] }
 0x6ac   :  { %v2062_v61 = vadd.f32 %v2061_v21, %v2060_v45 }
 0x6ae   :  { %v2106_v40 = vsel %vm2098_vm12, %v2062_v61, %v2105_v37 }
 0x6af   :  { %2113 = vrot.lane.b32.xlu0 %v2106_v40, %s2935_s3  ;;  %v2110_v55 = vadd.f32 %v2448_v50, %v2106_v40 }
 0x702   :  { %v2112_v26 = vpop.permute.xlu1 %2111 }
 0x703   :  { %v2117_v12 = vadd.f32 %v2112_v26, %v2109_v34 }
 0x705   :  { %v2121_v13 = vsel %vm156_vm1, %v2117_v12, 0.0 }
 0x721   :  { %v2114_v52 = vpop.permute.xlu0 %2113 }
 0x722   :  { %v2118_v24 = vadd.f32 %v2114_v52, %v2110_v55 }
 0x724   :  { %v2122_v9 = vsel %vm156_vm1, %v2118_v24, 0.0 }
 0x725   :  { %v2123_v2 = vadd.f32 %v2122_v9, %v2121_v13 }
 0x727   :  { %v2124_v19 = vrot.slane %v2123_v2, 4 }
 0x729   :  { %v2125_v41 = vadd.f32 %v2124_v19, %v2123_v2 }
 0x72b   :  { %v2126_v27 = vrot.slane %v2125_v41, 2 }
 0x72d   :  { %v2127_v35 = vadd.f32 %v2126_v27, %v2125_v41 }
 0x72f   :  { %v2128_v44 = vrot.slane %v2127_v35, 1 }
 0x731   :  { %v2129_v0 = vadd.f32 %v2128_v44, %v2127_v35 }
 0x733   :  { %v2130_v3 = vmul.f32 0.0625, %v2129_v0 }
 0x735   :  { %v2131_v62 = vsub.f32 %v2117_v12, %v2130_v3  ;;  %v2132_v38 = vsub.f32 %v2118_v24, %v2130_v3 }
 0x737   :  { %v2133_v11 = vmul.f32 %v2131_v62, %v2131_v62  ;;  %v2134_v23 = vmul.f32 %v2132_v38, %v2132_v38 }
 0x739   :  { %v2135_v36 = vsel %vm156_vm1, %v2133_v11, 0.0  ;;  %v2136_v8 = vsel %vm156_vm1, %v2134_v23, 0.0 }
 0x73a   :  { %v2137_v42 = vadd.f32 %v2136_v8, %v2135_v36 }
 0x73c   :  { %v2138_v60 = vrot.slane %v2137_v42, 4 }
 0x73e   :  { %v2139_v33 = vadd.f32 %v2138_v60, %v2137_v42 }
 0x740   :  { %v2140_v29 = vrot.slane %v2139_v33, 2 }
 0x742   :  { %v2141_v39 = vadd.f32 %v2140_v29, %v2139_v33 }
 0x744   :  { %v2142_v43 = vrot.slane %v2141_v39, 1 }
 0x746   :  { %v2143_v58 = vadd.f32 %v2142_v43, %v2141_v39 }
 0x748   :  { %v2144_v5 = vmul.f32 0.0625, %v2143_v58 }
 0x74a   :  { %v2145_v56 = vadd.f32 1e-05, %v2144_v5 }
 0x74c   :  { %2899 = vrsqrt.f32 %v2145_v56 }
 0x756   :  { %v2900_v63 = vpop.eup %2899 }
 0x757   :  { %v2147_v54 = vmul.f32 %v2900_v63, %v2131_v62  ;;  %v2148_v16 = vmul.f32 %v2900_v63, %v2132_v38 }
 0x759   :  { %v2155_v51 = vmul.f32 %v2449_v4, %v2147_v54  ;;  %v2156_v47 = vmul.f32 %v2449_v4, %v2148_v16 }
 0x75b   :  { %v2164_v17 = vadd.f32 %v2450_v22, %v2156_v47  ;;  %v2163_v59 = vadd.f32 %v2450_v22, %v2155_v51 }
 0x75d   :  { %v2452_v25 = vmul.f32 -1.442695, %v2164_v17  ;;  %v2451_v28 = vmul.f32 -1.442695, %v2163_v59 }
 0x75f   :  { %2901 = vpow2.f32 %v2452_v25 }
 0x760   :  { %2903 = vpow2.f32 %v2451_v28 }
 0x769   :  { %v2902_v48 = vpop.eup %2901 }
 0x76a   :  { %v2904_v10 = vpop.eup %2903  ;;  %v2172_v6 = vadd.f32 1.0, %v2902_v48 }
 0x76b   :  { %v2171_v7 = vadd.f32 1.0, %v2904_v10 }
 0x76c   :  { %2905 = vrcp.f32 %v2172_v6 }
 0x76d   :  { %2907 = vrcp.f32 %v2171_v7 }
 0x776   :  { %v2906_v49 = vpop.eup %2905 }
 0x777   :  { %v2908_v20 = vpop.eup %2907  ;;  %v2178_v31 = vmul.f32 %v2906_v49, %v2164_v17 }
 0x778   :  { %v2177_v1 = vmul.f32 %v2908_v20, %v2163_v59 }
 0x77a   :  { %2710 = vmatprep.mubr.msk.f32.mxu0 %vm156_vm1, %v2177_v1 }
 0x77b   :  { %2711 = vmatmul.mubr.msk.f32.vlgmr.msra.gmra.mrb[36].mxu0 %vm156_vm1, %v2178_v31 }
 0x77c   :  { %2721 = vmatprep.mubr.msk.f32.mxu0 %vm156_vm1, %v2909_v53 }
 0x84e   :  { %v2712_v45 = vpop.f32.mrb[36].mxu0 }
 0x84f   :  { %v2255_v18 = vpop.f32.mrb[37].mxu0 }
 0x850   :  { %v2788_v21 = vpack.i.bf16 %v2712_v45, %v2255_v18  ;;  %v2768_v37 = vpack.c.bf16 %v2712_v45, %v2255_v18 }
 0x852   :  { %2789 = vrot.lane.b32.xlu1 %v2788_v21, %s2938_s20  ;;  %2769 = vmatprep.subr.bf16.mxu0 %v2768_v37 }
 0x853   :  { %2771 = vmatpush3.bf16.msra.mxu0 %v2768_v37 }
 0x8c4   :  { %v2790_v61 = vpop.permute.xlu1 %2789 }
 0x8c5   :  { %v2792_v40 = vunpack.i.h.bf16 %v2790_v61  ;;  %v2791_v32 = vunpack.i.l.bf16 %v2790_v61 }
 0x8c7   :  { %v2772_v14 = vpack.c.bf16 %v2792_v40, %v2791_v32 }
 0x8c9   :  { %2773 = vmatprep.subr.bf16.mxu0 %v2772_v14 }
 0x8ca   :  { %2775 = vmatpush3.bf16.msra.mxu0 %v2772_v14 }
 0x8cd   :  { %2722 = vmatmul.mubr.msk.f32.vlgmr.msra.gmra.mrb[38].mxu0 %vm156_vm1, %v2910_v57 }
 0x9a0   :  { %v2723_v15 = vpop.f32.mrb[38].mxu0 }
 0x9a1   :  { %v2351_v30 = vadd.f32 %v2723_v15, %v2455_v46  ;;  %v2345_v50 = vpop.f32.mrb[39].mxu0 }
 0x9a2   :  { %v2346_v26 = vadd.f32 %v2455_v46, %v2345_v50 }
 0x9a3   :  { %2355 = vst.msk [vmem:[#allocation2 + $0x8] sm:$0xff] %vm1131_vm5, %v2351_v30 }
 0x9a4   :  { %2354 = vst.msk [vmem:[#allocation2] sm:$0xff] %vm1131_vm5, %v2346_v26 }
 0x9a5   :  { %2922 = shalt.err (!%p2919_p4)
}
 0x9a6   :  { %s2923_s5 = scalar_lea.hbm %s3922_s16, 256 }
 0x9a7   :  { %p2924_p5 = scmp.ne.s32.totalorder %s3922_s16, %s2923_s5  ;;  %p2927_p6 = scmp.lt.u32.totalorder %s2923_s5, %s3922_s16 }
 0x9a9   :  { %p2929_p7 = pnand %p2927_p6, %p2924_p5 }
 0x9ab   :  { %2932 = shalt.err (!%p2929_p7)
}
 0x9ac   :  { %s2940_s12 = smov 128   ;;  %s2941_s13 = smov 8  }
 0x9ad   :  { %2367 = dma.vmem_to_hbm [thread:$0]  %s2362_s26, 256, %s3922_s16, [#allocation3], %s2940_s12, %s2940_s12, %s2941_s13  }
 0x9ae   :  { %2933 = dma.done.wait [#allocation3], 256  }
 0x9af   :  { %2934 = vsyncadd [#allocation3], 4294967040 }
 0x9b0   :  { %2371 = vsyncpa [#allocation3], 1 }

</bundles_post_ra>
